<compile_context>
chip_gen: v6e
topology: v6e:2x2x1
jax: 0.10.0
libtpu: 0.0.40
codegen_flags: <defaults>
</compile_context>

<pallas_src>
import functools

import jax
import jax.numpy as jnp
import numpy as np
from jax import lax
from jax.experimental import pallas as pl
from jax.experimental.pallas import tpu as pltpu

_NEG_CLAMP = -100.0  # PyTorch F.binary_cross_entropy clamps log() at -100


def _affinity_loss_kernel(pred_ref, label_ref, out_ref, *, tr, a_dim,
                          binary_labels):
    """One (TB, TR, A) block -> (unary partial sum, global partial sum)."""
    r = pl.program_id(1)  # row-tile index (global row offset = r * tr)

    pred = pred_ref[...].astype(jnp.float32)    # (TB, TR, A)
    label = label_ref[...].astype(jnp.float32)  # (TB, TR, A)
    tb = pred.shape[0]

    one_minus_pred = 1.0 - pred                 # reused by unary + specificity

    # ---- unary term: elementwise BCE(pred, label), summed over the block ----
    if binary_labels:
        # Exact for hard {0,1} labels: one log per element instead of two
        # (EUP transcendentals are the saturated slot on v5e/v6e).
        p_sel = jnp.where(label > 0.5, pred, one_minus_pred)
        bce = -jnp.maximum(jnp.log(p_sel), _NEG_CLAMP)
    else:
        logp = jnp.maximum(jnp.log(pred), _NEG_CLAMP)
        log1mp = jnp.maximum(jnp.log(one_minus_pred), _NEG_CLAMP)
        bce = -(label * logp + (1.0 - label) * log1mp)
    unary_sum = jnp.sum(bce)

    # ---- vtarget = (1 - eye(A)) * label, folded as a single select ----
    local_row = lax.broadcasted_iota(jnp.int32, (tb, tr, a_dim), 1)
    col = lax.broadcasted_iota(jnp.int32, (tb, tr, a_dim), 2)
    global_row = local_row + r * tr
    vtarget = jnp.where(global_row == col, 0.0, label)

    # ---- recall part ----
    num = jnp.sum(pred * vtarget, axis=2, keepdims=True)           # (TB, TR, 1)
    den_r = jnp.sum(vtarget, axis=2, keepdims=True)
    recall = num / jnp.where(den_r > 0, den_r, 1.0)

    # ---- specificity part ----
    spec_num = jnp.sum(one_minus_pred * (1.0 - label), axis=2, keepdims=True)
    den_s = jnp.sum(1.0 - label, axis=2, keepdims=True)
    spec = spec_num / jnp.where(den_s > 0, den_s, 1.0)

    # ---- precision part ----
    den_p = jnp.sum(pred, axis=2, keepdims=True)
    prec = num / jnp.where(den_p > 0, den_p, 1.0)

    # BCE against all-ones target = -log(p) (clamped), summed over the block.
    neglog = lambda x: -jnp.maximum(jnp.log(x), _NEG_CLAMP)
    global_sum = jnp.sum(neglog(recall) + neglog(spec) + neglog(prec))

    # ---- lane-dense partial-sum write (lane 0 = unary, lane 1 = global) ----
    lane = lax.broadcasted_iota(jnp.int32, (1, 128), 1)
    vec = (jnp.where(lane == 0, unary_sum, 0.0)
           + jnp.where(lane == 1, global_sum, 0.0))
    out_ref[0, 0] = vec


def _largest_divisor_leq(n, cap, multiple_of=1):
    cap = min(cap, n)
    for d in range(cap, 0, -1):
        if n % d == 0 and d % multiple_of == 0:
            return d
    return None


def _choose_tiles(n, a, itemsize, budget_bytes):
    """Pick (TB, TR): TB batch images / TR affinity rows per block."""
    row_bytes = a * itemsize
    if a * row_bytes <= budget_bytes or a % 8 != 0:
        tr = a  # whole (A, A) map fits (or A not 8-aligned -> full rows)
    else:
        cap = max(1, budget_bytes // row_bytes)
        tr = _largest_divisor_leq(a, cap, multiple_of=8) or 8
    block_bytes = tr * row_bytes
    cap_tb = max(1, budget_bytes // block_bytes)
    tb = _largest_divisor_leq(n, cap_tb) or 1
    return tb, tr


def affinity_loss(cls_score, label, loss_weight=1.0, binary_labels=False,
                  block_bytes_budget=2 * 1024 * 1024):
    """Pallas TPU implementation of AffinityLoss.forward (reduction='mean')."""
    N, A, A2 = cls_score.shape
    assert A == A2 and label.shape == cls_score.shape

    itemsize = jnp.dtype(cls_score.dtype).itemsize
    tb, tr = _choose_tiles(N, A, itemsize, block_bytes_budget)
    gb, gr = N // tb, A // tr

    kernel = functools.partial(_affinity_loss_kernel, tr=tr, a_dim=A,
                               binary_labels=bool(binary_labels))

    # 2 inputs x 2 pipeline buffers x block, plus in-kernel temps + headroom.
    block_bytes = tb * tr * A * itemsize
    vmem_limit = int(min(48 * 2**20, max(24 * 2**20, 12 * block_bytes)))

    partials = pl.pallas_call(
        kernel,
        out_shape=jax.ShapeDtypeStruct((gb, gr, 1, 128), jnp.float32),
        grid=(gb, gr),
        in_specs=[
            pl.BlockSpec((tb, tr, A), lambda b, r: (b, r, 0)),
            pl.BlockSpec((tb, tr, A), lambda b, r: (b, r, 0)),
        ],
        out_specs=pl.BlockSpec((1, 1, 1, 128), lambda b, r: (b, r, 0, 0)),
        compiler_params=pltpu.CompilerParams(
            dimension_semantics=("parallel", "parallel"),
            vmem_limit_bytes=vmem_limit,
        ),
    )(cls_score, label)

    # Finalize ('mean' reduction + loss_weight) on tiny per-block partials.
    unary_total = jnp.sum(partials[..., 0])
    global_total = jnp.sum(partials[..., 1])
    unary_mean = unary_total / float(N * A * A)
    global_mean = global_total / float(N * A)
    return loss_weight * (unary_mean + global_mean)


def _bce_ref(p, y):
    logp = jnp.maximum(jnp.log(p), _NEG_CLAMP)
    log1mp = jnp.maximum(jnp.log(1.0 - p), _NEG_CLAMP)
    return -(y * logp + (1.0 - y) * log1mp)


def affinity_loss_ref(cls_score, label, loss_weight=1.0):
    """Pure-JAX reference, mirrors the PyTorch module exactly."""
    pred = cls_score.astype(jnp.float32)
    lab = label.astype(jnp.float32)
    A = lab.shape[1]

    unary = jnp.mean(_bce_ref(pred, lab))

    diag = 1.0 - jnp.eye(A, dtype=jnp.float32)
    vt = diag * lab

    num = jnp.sum(pred * vt, axis=2)
    den_r = jnp.sum(vt, axis=2)
    recall = num / jnp.where(den_r > 0, den_r, 1.0)
    recall_loss = jnp.mean(_bce_ref(recall, jnp.ones_like(recall)))

    spec_num = jnp.sum((1.0 - pred) * (1.0 - lab), axis=2)
    den_s = jnp.sum(1.0 - lab, axis=2)
    spec = spec_num / jnp.where(den_s > 0, den_s, 1.0)
    spec_loss = jnp.mean(_bce_ref(spec, jnp.ones_like(spec)))

    den_p = jnp.sum(pred, axis=2)
    prec = num / jnp.where(den_p > 0, den_p, 1.0)
    prec_loss = jnp.mean(_bce_ref(prec, jnp.ones_like(prec)))

    return loss_weight * (unary + recall_loss + spec_loss + prec_loss)


if __name__ == "__main__":
    # Small shapes: batch=2, affinity dim A = 8*8 spatial = 64.
    N, A = 2, 64
    key = jax.random.PRNGKey(0)
    k1, k2 = jax.random.split(key)

    # cls_score are probabilities in (0, 1); label is a binary affinity map.
    cls_score = jax.random.uniform(k1, (N, A, A), dtype=jnp.float32,
                                   minval=0.01, maxval=0.99)
    label = (jax.random.uniform(k2, (N, A, A)) > 0.5).astype(jnp.float32)

    loss_ref = jax.block_until_ready(affinity_loss_ref(cls_score, label, 1.0))

    # Fast path: one-log BCE (labels are hard {0,1}).
    loss_fast = jax.block_until_ready(
        affinity_loss(cls_score, label, loss_weight=1.0, binary_labels=True))
    np.testing.assert_allclose(np.asarray(loss_fast), np.asarray(loss_ref),
                               rtol=1e-4, atol=1e-4)

    # General path: exact two-log BCE (also correct for soft labels).
    loss_gen = jax.block_until_ready(
        affinity_loss(cls_score, label, loss_weight=1.0, binary_labels=False))
    np.testing.assert_allclose(np.asarray(loss_gen), np.asarray(loss_ref),
                               rtol=1e-4, atol=1e-4)

    print("KERNEL_OK")
</pallas_src>

<mosaic_0001>
module attributes {stable_mosaic.version = 11 : i64} {
  func.func @_affinity_loss_kernel(%arg0: i32, %arg1: i32, %arg2: memref<2x64x64xf32, #tpu.memory_space<vmem>>, %arg3: memref<2x64x64xf32, #tpu.memory_space<vmem>>, %arg4: memref<1x1x1x128xf32, #tpu.memory_space<vmem>>) attributes {dimension_semantics = [#tpu.dimension_semantics<parallel>, #tpu.dimension_semantics<parallel>], iteration_bounds = array<i64: 1, 1>, scalar_prefetch = 0 : i64, scratch_operands = 0 : i64, tpu.core_type = #tpu.core_type<tc>, window_params = [{transform_indices = @transform_0, window_bounds = array<i64: 2, 64, 64>}, {transform_indices = @transform_1, window_bounds = array<i64: 2, 64, 64>}, {transform_indices = @transform_2, window_bounds = array<i64: 1, 1, 1, 128>}]} {
    %c0 = arith.constant 0 : index
    %c0_0 = arith.constant 0 : index
    %c0_1 = arith.constant 0 : index
    %0 = vector.load %arg2[%c0, %c0_0, %c0_1] : memref<2x64x64xf32, #tpu.memory_space<vmem>>, vector<2x64x64xf32>
    %c0_2 = arith.constant 0 : index
    %c0_3 = arith.constant 0 : index
    %c0_4 = arith.constant 0 : index
    %1 = vector.load %arg3[%c0_2, %c0_3, %c0_4] : memref<2x64x64xf32, #tpu.memory_space<vmem>>, vector<2x64x64xf32>
    %cst = arith.constant 1.000000e+00 : f32
    %2 = vector.broadcast %cst : f32 to vector<2x64x64xf32>
    %3 = arith.subf %2, %0 : vector<2x64x64xf32>
    %cst_5 = arith.constant 5.000000e-01 : f32
    %4 = vector.broadcast %cst_5 : f32 to vector<2x64x64xf32>
    %5 = arith.cmpf ogt, %1, %4 : vector<2x64x64xf32>
    %6 = arith.select %5, %0, %3 : vector<2x64x64xi1>, vector<2x64x64xf32>
    %7 = math.log %6 : vector<2x64x64xf32>
    %cst_6 = arith.constant -1.000000e+02 : f32
    %8 = vector.broadcast %cst_6 : f32 to vector<2x64x64xf32>
    %9 = arith.maximumf %7, %8 : vector<2x64x64xf32>
    %cst_7 = arith.constant 0.000000e+00 : f32
    %10 = vector.broadcast %cst_7 : f32 to vector<2x64x64xf32>
    %11 = arith.subf %10, %9 : vector<2x64x64xf32>
    %12 = vector.shape_cast %11 : vector<2x64x64xf32> to vector<1x2x64x64xf32>
    %cst_8 = arith.constant dense<0.000000e+00> : vector<1xf32>
    %13 = vector.multi_reduction <add>, %12, %cst_8 [1, 2, 3] : vector<1x2x64x64xf32> to vector<1xf32>
    %14 = vector.shape_cast %13 : vector<1xf32> to vector<1x1x1x1xf32>
    %15 = vector.extract %14[0, 0, 0, 0] : f32 from vector<1x1x1x1xf32>
    %16 = tpu.iota {dimensions = array<i32: 1>} : vector<2x64x64xi32>
    %17 = tpu.iota {dimensions = array<i32: 2>} : vector<2x64x64xi32>
    %c64_i32 = arith.constant 64 : i32
    %18 = arith.muli %arg1, %c64_i32 : i32
    %19 = vector.broadcast %18 : i32 to vector<2x64x64xi32>
    %20 = arith.addi %16, %19 : vector<2x64x64xi32>
    %21 = arith.cmpi eq, %20, %17 : vector<2x64x64xi32>
    %cst_9 = arith.constant 0.000000e+00 : f32
    %22 = vector.broadcast %cst_9 : f32 to vector<2x64x64xf32>
    %23 = arith.select %21, %22, %1 : vector<2x64x64xi1>, vector<2x64x64xf32>
    %24 = arith.mulf %0, %23 : vector<2x64x64xf32>
    %cst_10 = arith.constant dense<0.000000e+00> : vector<2x64xf32>
    %25 = vector.multi_reduction <add>, %24, %cst_10 [2] : vector<2x64x64xf32> to vector<2x64xf32>
    %26 = vector.shape_cast %25 : vector<2x64xf32> to vector<2x64x1xf32>
    %cst_11 = arith.constant dense<0.000000e+00> : vector<2x64xf32>
    %27 = vector.multi_reduction <add>, %23, %cst_11 [2] : vector<2x64x64xf32> to vector<2x64xf32>
    %28 = vector.shape_cast %27 : vector<2x64xf32> to vector<2x64x1xf32>
    %cst_12 = arith.constant 0.000000e+00 : f32
    %29 = vector.broadcast %cst_12 : f32 to vector<2x64x1xf32>
    %30 = arith.cmpf ogt, %28, %29 : vector<2x64x1xf32>
    %cst_13 = arith.constant 1.000000e+00 : f32
    %31 = vector.broadcast %cst_13 : f32 to vector<2x64x1xf32>
    %32 = arith.select %30, %28, %31 : vector<2x64x1xi1>, vector<2x64x1xf32>
    %33 = arith.divf %26, %32 : vector<2x64x1xf32>
    %cst_14 = arith.constant 1.000000e+00 : f32
    %34 = vector.broadcast %cst_14 : f32 to vector<2x64x64xf32>
    %35 = arith.subf %34, %1 : vector<2x64x64xf32>
    %36 = arith.mulf %3, %35 : vector<2x64x64xf32>
    %cst_15 = arith.constant dense<0.000000e+00> : vector<2x64xf32>
    %37 = vector.multi_reduction <add>, %36, %cst_15 [2] : vector<2x64x64xf32> to vector<2x64xf32>
    %38 = vector.shape_cast %37 : vector<2x64xf32> to vector<2x64x1xf32>
    %cst_16 = arith.constant 1.000000e+00 : f32
    %39 = vector.broadcast %cst_16 : f32 to vector<2x64x64xf32>
    %40 = arith.subf %39, %1 : vector<2x64x64xf32>
    %cst_17 = arith.constant dense<0.000000e+00> : vector<2x64xf32>
    %41 = vector.multi_reduction <add>, %40, %cst_17 [2] : vector<2x64x64xf32> to vector<2x64xf32>
    %42 = vector.shape_cast %41 : vector<2x64xf32> to vector<2x64x1xf32>
    %cst_18 = arith.constant 0.000000e+00 : f32
    %43 = vector.broadcast %cst_18 : f32 to vector<2x64x1xf32>
    %44 = arith.cmpf ogt, %42, %43 : vector<2x64x1xf32>
    %cst_19 = arith.constant 1.000000e+00 : f32
    %45 = vector.broadcast %cst_19 : f32 to vector<2x64x1xf32>
    %46 = arith.select %44, %42, %45 : vector<2x64x1xi1>, vector<2x64x1xf32>
    %47 = arith.divf %38, %46 : vector<2x64x1xf32>
    %cst_20 = arith.constant dense<0.000000e+00> : vector<2x64xf32>
    %48 = vector.multi_reduction <add>, %0, %cst_20 [2] : vector<2x64x64xf32> to vector<2x64xf32>
    %49 = vector.shape_cast %48 : vector<2x64xf32> to vector<2x64x1xf32>
    %cst_21 = arith.constant 0.000000e+00 : f32
    %50 = vector.broadcast %cst_21 : f32 to vector<2x64x1xf32>
    %51 = arith.cmpf ogt, %49, %50 : vector<2x64x1xf32>
    %cst_22 = arith.constant 1.000000e+00 : f32
    %52 = vector.broadcast %cst_22 : f32 to vector<2x64x1xf32>
    %53 = arith.select %51, %49, %52 : vector<2x64x1xi1>, vector<2x64x1xf32>
    %54 = arith.divf %26, %53 : vector<2x64x1xf32>
    %55 = math.log %33 : vector<2x64x1xf32>
    %cst_23 = arith.constant -1.000000e+02 : f32
    %56 = vector.broadcast %cst_23 : f32 to vector<2x64x1xf32>
    %57 = arith.maximumf %55, %56 : vector<2x64x1xf32>
    %cst_24 = arith.constant 0.000000e+00 : f32
    %58 = vector.broadcast %cst_24 : f32 to vector<2x64x1xf32>
    %59 = arith.subf %58, %57 : vector<2x64x1xf32>
    %60 = math.log %47 : vector<2x64x1xf32>
    %cst_25 = arith.constant -1.000000e+02 : f32
    %61 = vector.broadcast %cst_25 : f32 to vector<2x64x1xf32>
    %62 = arith.maximumf %60, %61 : vector<2x64x1xf32>
    %cst_26 = arith.constant 0.000000e+00 : f32
    %63 = vector.broadcast %cst_26 : f32 to vector<2x64x1xf32>
    %64 = arith.subf %63, %62 : vector<2x64x1xf32>
    %65 = arith.addf %59, %64 : vector<2x64x1xf32>
    %66 = math.log %54 : vector<2x64x1xf32>
    %cst_27 = arith.constant -1.000000e+02 : f32
    %67 = vector.broadcast %cst_27 : f32 to vector<2x64x1xf32>
    %68 = arith.maximumf %66, %67 : vector<2x64x1xf32>
    %cst_28 = arith.constant 0.000000e+00 : f32
    %69 = vector.broadcast %cst_28 : f32 to vector<2x64x1xf32>
    %70 = arith.subf %69, %68 : vector<2x64x1xf32>
    %71 = arith.addf %65, %70 : vector<2x64x1xf32>
    %72 = vector.shape_cast %71 : vector<2x64x1xf32> to vector<1x2x64x1xf32>
    %cst_29 = arith.constant dense<0.000000e+00> : vector<1xf32>
    %73 = vector.multi_reduction <add>, %72, %cst_29 [1, 2, 3] : vector<1x2x64x1xf32> to vector<1xf32>
    %74 = vector.shape_cast %73 : vector<1xf32> to vector<1x1x1x1xf32>
    %75 = vector.extract %74[0, 0, 0, 0] : f32 from vector<1x1x1x1xf32>
    %76 = tpu.iota {dimensions = array<i32: 1>} : vector<1x128xi32>
    %c0_i32 = arith.constant 0 : i32
    %77 = vector.broadcast %c0_i32 : i32 to vector<1x128xi32>
    %78 = arith.cmpi eq, %76, %77 : vector<1x128xi32>
    %cst_30 = arith.constant 0.000000e+00 : f32
    %79 = vector.broadcast %15 : f32 to vector<1x128xf32>
    %80 = vector.broadcast %cst_30 : f32 to vector<1x128xf32>
    %81 = arith.select %78, %79, %80 : vector<1x128xi1>, vector<1x128xf32>
    %c1_i32 = arith.constant 1 : i32
    %82 = vector.broadcast %c1_i32 : i32 to vector<1x128xi32>
    %83 = arith.cmpi eq, %76, %82 : vector<1x128xi32>
    %cst_31 = arith.constant 0.000000e+00 : f32
    %84 = vector.broadcast %75 : f32 to vector<1x128xf32>
    %85 = vector.broadcast %cst_31 : f32 to vector<1x128xf32>
    %86 = arith.select %83, %84, %85 : vector<1x128xi1>, vector<1x128xf32>
    %87 = arith.addf %81, %86 : vector<1x128xf32>
    %c0_32 = arith.constant 0 : index
    %c0_33 = arith.constant 0 : index
    %c0_34 = arith.constant 0 : index
    %c0_35 = arith.constant 0 : index
    %88 = vector.load %arg4[%c0_32, %c0_33, %c0_34, %c0_35] : memref<1x1x1x128xf32, #tpu.memory_space<vmem>>, vector<1x1x1x128xf32>
    %89 = vector.shape_cast %88 : vector<1x1x1x128xf32> to vector<1x128xf32>
    %90 = vector.shape_cast %87 : vector<1x128xf32> to vector<1x1x1x128xf32>
    tpu.vector_store %arg4[%c0_32, %c0_33, %c0_34, %c0_35], %90 {strides = array<i32>} : memref<1x1x1x128xf32, #tpu.memory_space<vmem>>, vector<1x1x1x128xf32>,
    return
  }
  func.func @transform_0(%arg0: i32, %arg1: i32) -> (i32, i32, i32) {
    %c0_i32 = arith.constant 0 : i32
    %c0_i32_0 = arith.constant 0 : i32
    return %arg0, %arg1, %c0_i32 : i32, i32, i32
  }
  func.func @transform_1(%arg0: i32, %arg1: i32) -> (i32, i32, i32) {
    %c0_i32 = arith.constant 0 : i32
    %c0_i32_0 = arith.constant 0 : i32
    return %arg0, %arg1, %c0_i32 : i32, i32, i32
  }
  func.func @transform_2(%arg0: i32, %arg1: i32) -> (i32, i32, i32, i32) {
    %c0_i32 = arith.constant 0 : i32
    %c0_i32_0 = arith.constant 0 : i32
    %c0_i32_1 = arith.constant 0 : i32
    return %arg0, %arg1, %c0_i32, %c0_i32_0 : i32, i32, i32, i32
  }
}

</mosaic_0001>

<bundles_post_ra>
// kernel: tpu_custom_call.1
= control target key start
LH: loop header
LB: loop body
LE: loop exit
PB: predicated region body
PF: predicated region fallthrough
CT: control target
= control target key end

     0   :  { %7 = vsyncpa [#allocation3], 0  ;;  %s2214_s0 = inlined_call_operand.hbm [shape: f32[2,64,64], index: 0, kind: input, shape index: {}]   ;;  %s2215_s1 = inlined_call_operand.hbm [shape: f32[2,64,64], index: 1, kind: input, shape index: {}]   ;;  %s2216_s2 = inlined_call_operand.hbm [shape: f32[1,1,1,128], index: 2, kind: output, shape index: {}]  }
   0x1   :  { %8 = vsyncpa [#allocation6], 0 }
   0x2   :  { %9 = vsyncpa [#allocation4], 0  ;;  %s1338_s9 = smov [#allocation2]  }
   0x3   :  { %s15_s10 = sshll.u32 %s1338_s9, 4  ;;  %s16_s10 = int_to_ptr.vmem [resolvable:$true] %s15_s10 }
   0x4   :  { %s1280_s11 = scalar_lea.vmem %s16_s10, 2048  ;;  %p1285_p1 = scmp.lt.s32.totalorder %s16_s10, %s16_s10 }
   0x5   :  { %p1281_p0 = scmp.ne.s32.totalorder %s16_s10, %s1280_s11  ;;  %p1286_p2 = scmp.lt.s32.totalorder %s1280_s11, %s1280_s11 }
   0x7   :  { %p1287_p3 = por %p1286_p2, %p1285_p1 }
   0x9   :  { %p1288_p4 = pnand %p1287_p3, %p1281_p0 }
   0xb   :  { %1291 = shalt.err (!%p1288_p4)
}
   0xc   :  { %s1339_s12 = smov 128   ;;  %s1340_s13 = smov 8  }
   0xd   :  { %21 = dma.hbm_to_vmem [thread:$0]  %s2214_s0, 2048, %s16_s10, [#allocation3], %s1339_s12, %s1339_s12, %s1340_s13  }
   0xe   :  { %s1341_s16 = smov [#allocation5]  }
   0xf   :  { %s27_s17 = sshll.u32 %s1341_s16, 4  ;;  %s28_s17 = int_to_ptr.vmem [resolvable:$true] %s27_s17 }
  0x10   :  { %s1300_s18 = scalar_lea.vmem %s28_s17, 2048  ;;  %p1305_p6 = scmp.lt.s32.totalorder %s28_s17, %s28_s17 }
  0x11   :  { %p1301_p5 = scmp.ne.s32.totalorder %s28_s17, %s1300_s18  ;;  %p1306_p7 = scmp.lt.s32.totalorder %s1300_s18, %s1300_s18 }
  0x13   :  { %p1307_p8 = por %p1306_p7, %p1305_p6 }
  0x15   :  { %p1308_p9 = pnand %p1307_p8, %p1301_p5 }
  0x17   :  { %1311 = shalt.err (!%p1308_p9)
}
  0x18   :  { %33 = dma.hbm_to_vmem [thread:$0]  %s2215_s1, 2048, %s28_s17, [#allocation6], %s1339_s12, %s1339_s12, %s1340_s13  }
  0x19   :  { %1332 = dma.done.wait [#allocation3], 2048  }
  0x1a   :  { %1333 = vsyncadd [#allocation3], 4294965248 }
  0x1b   :  { %1334 = dma.done.wait [#allocation6], 2048  }
  0x1c   :  { %1335 = vsyncadd [#allocation6], 4294965248  ;;  %v225_v0 = vlaneseq  ;;  %vm184_vm1 = vcmask 523264   ;;  %v1378_v5 = vld [vmem:[#allocation5] sm:$0xff]  ;;  %v1380_v6 = vld [vmem:[#allocation5 + $0x8] sm:$0xff]  ;;  %s1342_s21 = smov [#allocation7]  }
  0x1d   :  { %v446_v8 = vsub.f32 1.0, %v1378_v5  ;;  %v447_v11 = vsub.f32 1.0, %v1380_v6  ;;  %v1398_v12 = vld [vmem:[#allocation5 + $0x10] sm:$0xff]  ;;  %v1422_v20 = vld [vmem:[#allocation2] sm:$0xff]  ;;  %v1427_v22 = vld [vmem:[#allocation2 + $0x8] sm:$0xff]  ;;  %vm88_vm5 = vcmp.gt.f32.partialorder %v1378_v5, 0.5 }
  0x1e   :  { %v1364_v1 = vshrl.u32 %v225_v0, 7  ;;  %v1366_v2 = vand.u32 127, %v225_v0  ;;  %v448_v17 = vsub.f32 1.0, %v1398_v12  ;;  %v1429_v23 = vld [vmem:[#allocation5 + $0x18] sm:$0xff]  ;;  %v638_v25 = vsel %vm184_vm1, %v1422_v20, 0.0  ;;  %v1449_v29 = vld [vmem:[#allocation5 + $0x20] sm:$0xff] }
  0x1f   :  { %v526_v13 = vsel %vm184_vm1, %v446_v8, 0.0  ;;  %v529_v15 = vsel %vm184_vm1, %v447_v11, 0.0  ;;  %v641_v26 = vsel %vm184_vm1, %v1427_v22, 0.0  ;;  %v2227_v28 = vsub.f32 1.0, %v1429_v23  ;;  %v1460_v34 = vld [vmem:[#allocation2 + $0x10] sm:$0xff]  ;;  %v1485_v43 = vld [vmem:[#allocation2 + $0x18] sm:$0xff] }
  0x20   :  { %v1369_v3 = vadd.s32 8, %v1364_v1  ;;  %vm246_vm0 = vcmp.eq.s32.totalorder %v1364_v1, %v1366_v2  ;;  %v1374_v4 = vadd.s32 16, %v1364_v1  ;;  %527 = vadd.xlane.f32.xlu1 %v526_v13  ;;  %v1418_v18 = vadd.s32 24, %v1364_v1  ;;  %v1487_v44 = vld [vmem:[#allocation5 + $0x28] sm:$0xff]  ;;  %v1511_v52 = vld [vmem:[#allocation2 + $0x20] sm:$0xff]  ;;  %v1519_v55 = vld [vmem:[#allocation5 + $0x30] sm:$0xff] }
  0x21   :  { %v1386_v7 = vsel %vm246_vm0, 0.0, %v1378_v5  ;;  %v532_v21 = vsel %vm184_vm1, %v448_v17, 0.0  ;;  %v1434_v24 = vadd.s32 32, %v1364_v1  ;;  %vm89_vm6 = vcmp.gt.f32.partialorder %v1380_v6, 0.5  ;;  %v1537_v60 = vld [vmem:[#allocation2 + $0x28] sm:$0xff]  ;;  %s1029_s22 = sshll.u32 %s1342_s21, 4  ;;  %s1030_s22 = int_to_ptr.vmem [resolvable:$true] %s1029_s22 }
  0x22   :  { %vm247_vm2 = vcmp.eq.s32.totalorder %v1369_v3, %v1366_v2  ;;  %v334_v9 = vsel %vm184_vm1, %v1386_v7, 0.0  ;;  %vm248_vm3 = vcmp.eq.s32.totalorder %v1374_v4, %v1366_v2  ;;  %vm249_vm4 = vcmp.eq.s32.totalorder %v1418_v18, %v1366_v2  ;;  %s1312_s23 = scalar_lea.vmem %s1030_s22, 16  ;;  %s1316_s24 = scalar_lea.vmem %s1030_s22, 32 }
  0x23   :  { %v1395_v10 = vsel %vm247_vm2, 0.0, %v1380_v6  ;;  %335 = vadd.xlane.f32.xlu0 %v334_v9  ;;  %v1414_v16 = vsel %vm248_vm3, 0.0, %v1398_v12  ;;  %v1444_v27 = vsel %vm249_vm4, 0.0, %v1429_v23  ;;  %vm250_vm7 = vcmp.eq.s32.totalorder %v1434_v24, %v1366_v2  ;;  %v1551_v9 = vld [vmem:[#allocation2 + $0x30] sm:$0xff]  ;;  %p1313_p10 = scmp.ne.s32.totalorder %s1030_s22, %s1312_s23  ;;  %p1317_p11 = scmp.lt.s32.totalorder %s1030_s22, %s1030_s22 }
  0x24   :  { %v337_v14 = vsel %vm184_vm1, %v1395_v10, 0.0  ;;  %530 = vadd.xlane.f32.xlu1 %v529_v15  ;;  %v340_v19 = vsel %vm184_vm1, %v1414_v16, 0.0  ;;  %v72_v30 = vsub.f32 1.0, %v1422_v20  ;;  %v73_v31 = vsub.f32 1.0, %v1427_v22  ;;  %v63_v15 = vld [vmem:[#allocation5 + $0x38] sm:$0xff]  ;;  %p1318_p12 = scmp.lt.s32.totalorder %s1316_s24, %s1312_s23 }
  0x25   :  { %v343_v32 = vsel %vm184_vm1, %v1444_v27, 0.0  ;;  %v535_v33 = vsel %vm184_vm1, %v2227_v28, 0.0  ;;  %v1472_v37 = vsel %vm250_vm7, 0.0, %v1449_v29  ;;  %v1475_v38 = vadd.s32 40, %v1364_v1  ;;  %v1656_v28 = vld [vmem:[#allocation2 + $0x60] sm:$0xff] }
  0x26   :  { %v104_v35 = vsel %vm88_vm5, %v1422_v20, %v72_v30  ;;  %v105_v36 = vsel %vm89_vm6, %v1427_v22, %v73_v31  ;;  %vm90_vm8 = vcmp.gt.f32.partialorder %v1398_v12, 0.5  ;;  %v644_v39 = vsel %vm184_vm1, %v1460_v34, 0.0  ;;  %p1319_p13 = por %p1318_p12, %p1317_p11 }
  0x27   :  { %338 = vadd.xlane.f32.xlu0 %v337_v14  ;;  %1048 = vlog2.f32 %v104_v35  ;;  %v2222_v40 = vsub.f32 1.0, %v1449_v29  ;;  %v74_v41 = vsub.f32 1.0, %v1460_v34  ;;  %v346_v42 = vsel %vm184_vm1, %v1472_v37, 0.0 }
  0x28   :  { %533 = vadd.xlane.f32.xlu1 %v532_v21  ;;  %1050 = vlog2.f32 %v105_v36  ;;  %vm91_vm9 = vcmp.gt.f32.partialorder %v1429_v23, 0.5  ;;  %vm251_vm10 = vcmp.eq.s32.totalorder %v1475_v38, %v1366_v2  ;;  %v1495_v46 = vadd.s32 48, %v1364_v1  ;;  %p1320_p0 = pnand %p1319_p13, %p1313_p10 }
  0x29   :  { %v106_v45 = vsel %vm90_vm8, %v1460_v34, %v74_v41  ;;  %v2228_v47 = vsub.f32 1.0, %v1485_v43  ;;  %vm92_vm11 = vcmp.gt.f32.partialorder %v1449_v29, 0.5  ;;  %v538_v48 = vsel %vm184_vm1, %v2222_v40, 0.0 }
  0x2a   :  { %1052 = vlog2.f32 %v106_v45  ;;  %v647_v49 = vsel %vm184_vm1, %v1485_v43, 0.0  ;;  %v1508_v50 = vsel %vm251_vm10, 0.0, %v1487_v44  ;;  %v2219_v51 = vsub.f32 1.0, %v1487_v44 }
  0x2b   :  { %341 = vadd.xlane.f32.xlu0 %v340_v19  ;;  %v107_v53 = vsel %vm91_vm9, %v1485_v43, %v2228_v47  ;;  %v2223_v54 = vsub.f32 1.0, %v1511_v52  ;;  %vm252_vm12 = vcmp.eq.s32.totalorder %v1495_v46, %v1366_v2  ;;  %v1524_v56 = vadd.s32 56, %v1364_v1  ;;  %v1605_v1 = vld [vmem:[#allocation5 + $0x50] sm:$0xff]  ;;  %v1816_v46 = vld [vmem:[#allocation5 + $0x78] sm:$0xff] }
  0x2c   :  { %642 = vadd.xlane.f32.xlu1 %v641_v26  ;;  %1054 = vlog2.f32 %v107_v53  ;;  %v349_v57 = vsel %vm184_vm1, %v1508_v50, 0.0  ;;  %vm93_vm13 = vcmp.gt.f32.partialorder %v1487_v44, 0.5  ;;  %v541_v59 = vsel %vm184_vm1, %v2219_v51, 0.0 }
  0x2d   :  { %v108_v58 = vsel %vm92_vm11, %v1511_v52, %v2223_v54  ;;  %v1543_v61 = vsel %vm252_vm12, 0.0, %v1519_v55  ;;  %v2220_v62 = vsub.f32 1.0, %v1537_v60  ;;  %v650_v0 = vsel %vm184_vm1, %v1511_v52, 0.0 }
  0x2e   :  { %1056 = vlog2.f32 %v108_v58  ;;  %vm94_vm14 = vcmp.gt.f32.partialorder %v1519_v55, 0.5  ;;  %vm253_vm15 = vcmp.eq.s32.totalorder %v1524_v56, %v1366_v2  ;;  %v2217_v14 = vsub.f32 1.0, %v1519_v55 }
  0x2f   :  { %639 = vadd.xlane.f32.xlu0 %v638_v25  ;;  %v109_v21 = vsel %vm93_vm13, %v1537_v60, %v2220_v62  ;;  %v2218_v25 = vsub.f32 1.0, %v1551_v9  ;;  %v352_v26 = vsel %vm184_vm1, %v1543_v61, 0.0  ;;  %v261_v36 = vsel %vm253_vm15, 0.0, %v63_v15 }
  0x30   :  { %536 = vadd.xlane.f32.xlu1 %v535_v33  ;;  %1058 = vlog2.f32 %v109_v21  ;;  %vm95_vm5 = vcmp.gt.f32.partialorder %v63_v15, 0.5  ;;  %v453_v58 = vsub.f32 1.0, %v63_v15  ;;  %v355_v21 = vsel %vm184_vm1, %v261_v36, 0.0 }
  0x31   :  { %v110_v35 = vsel %vm94_vm14, %v1551_v9, %v2218_v25 }
  0x32   :  { %1060 = vlog2.f32 %v110_v35 }
  0x33   :  { %344 = vadd.xlane.f32.xlu0 %v343_v32 }
  0x34   :  { %347 = vadd.xlane.f32.xlu1 %v346_v42  ;;  %v1049_v63 = vpop.eup %1048 }
  0x35   :  { %v1051_v13 = vpop.eup %1050  ;;  %v121_v19 = vmul.f32 0.6931472, %v1049_v63 }
  0x36   :  { %v123_v32 = vmul.f32 0.6931472, %v1051_v13 }
  0x37   :  { %645 = vadd.xlane.f32.xlu0 %v644_v39  ;;  %v152_v33 = vmax.f32 %v121_v19, -100.0  ;;  %v1568_v39 = vld [vmem:[#allocation2 + $0x38] sm:$0xff]  ;;  %v1053_v45 = vpop.eup %1052 }
  0x38   :  { %648 = vadd.xlane.f32.xlu1 %v647_v49  ;;  %v153_v42 = vmax.f32 %v123_v32, -100.0  ;;  %v653_v49 = vsel %vm184_vm1, %v1537_v60, 0.0  ;;  %v125_v63 = vmul.f32 0.6931472, %v1053_v45  ;;  %v79_v13 = vsub.f32 1.0, %v1568_v39 }
  0x39   :  { %v168_v53 = vsub.f32 0.0, %v152_v33  ;;  %v1055_v19 = vpop.eup %1054  ;;  %v547_v45 = vsel %vm184_vm1, %v453_v58, 0.0 }
  0x3a   :  { %v154_v33 = vmax.f32 %v125_v63, -100.0  ;;  %v111_v15 = vsel %vm95_vm5, %v1568_v39, %v79_v13 }
  0x3b   :  { %539 = vadd.xlane.f32.xlu0 %v538_v48  ;;  %v544_v48 = vsel %vm184_vm1, %v2217_v14, 0.0  ;;  %v127_v14 = vmul.f32 0.6931472, %v1055_v19  ;;  %1062 = vlog2.f32 %v111_v15 }
  0x3c   :  { %542 = vadd.xlane.f32.xlu1 %v541_v59  ;;  %v169_v59 = vsub.f32 0.0, %v153_v42  ;;  %v1585_v42 = vmul.f32 %v453_v58, %v79_v13  ;;  %v656_v58 = vsel %vm184_vm1, %v1551_v9, 0.0  ;;  %v1601_v13 = vld [vmem:[#allocation5 + $0x48] sm:$0xff] }
  0x3d   :  { %vm97_vm8 = vcmp.gt.f32.partialorder %v1601_v13, 0.5 }
  0x3e   :  { %v186_v32 = vsel %vm184_vm1, %v169_v59, 0.0  ;;  %v155_v59 = vmax.f32 %v127_v14, -100.0  ;;  %v1607_v14 = vld [vmem:[#allocation2 + $0x48] sm:$0xff] }
  0x3f   :  { %350 = vadd.xlane.f32.xlu0 %v349_v57  ;;  %v1576_v57 = vmul.f32 %v261_v36, %v1568_v39  ;;  %v1057_v36 = vpop.eup %1056  ;;  %v665_v12 = vsel %vm184_vm1, %v1607_v14, 0.0 }
  0x40   :  { %353 = vadd.xlane.f32.xlu1 %v352_v26  ;;  %v1581_v26 = vld [vmem:[#allocation5 + $0x40] sm:$0xff]  ;;  %v171_v15 = vsub.f32 0.0, %v155_v59 }
  0x41   :  { %vm96_vm6 = vcmp.gt.f32.partialorder %v1581_v26, 0.5 }
  0x42   :  { %v190_v59 = vsel %vm184_vm1, %v171_v15, 0.0 }
  0x43   :  { %651 = vadd.xlane.f32.xlu0 %v650_v0  ;;  %v185_v0 = vsel %vm184_vm1, %v168_v53, 0.0  ;;  %v1589_v53 = vld [vmem:[#allocation2 + $0x40] sm:$0xff] }
  0x44   :  { %654 = vadd.xlane.f32.xlu1 %v653_v49  ;;  %v187_v35 = vadd.f32 %v186_v32, %v185_v0  ;;  %v1595_v49 = vsel %vm246_vm0, 0.0, %v1581_v26  ;;  %v2221_v63 = vsub.f32 1.0, %v1589_v53  ;;  %v2225_v0 = vsub.f32 1.0, %v1581_v26 }
  0x45   :  { %v129_v32 = vmul.f32 0.6931472, %v1057_v36  ;;  %vm98_vm0 = vcmp.gt.f32.partialorder %v1605_v1, 0.5 }
  0x46   :  { %v550_v15 = vsel %vm184_vm1, %v2225_v0, 0.0  ;;  %v1653_v0 = vld [vmem:[#allocation2 + $0x58] sm:$0xff] }
  0x47   :  { %545 = vadd.xlane.f32.xlu0 %v544_v48  ;;  %v170_v48 = vsub.f32 0.0, %v154_v33  ;;  %v156_v36 = vmax.f32 %v129_v32, -100.0  ;;  %v270_v32 = vmul.f32 %v1386_v7, %v1422_v20  ;;  %v83_v47 = vsub.f32 1.0, %v1653_v0 }
  0x48   :  { %548 = vadd.xlane.f32.xlu1 %v547_v45  ;;  %v1619_v45 = vld [vmem:[#allocation2 + $0x50] sm:$0xff] }
  0x49   :  { %v188_v19 = vsel %vm184_vm1, %v170_v48, 0.0  ;;  %v358_v48 = vsel %vm184_vm1, %v1595_v49, 0.0  ;;  %v2226_v25 = vsub.f32 1.0, %v1619_v45  ;;  %v172_v62 = vsub.f32 0.0, %v156_v36 }
  0x4a   :  { %v189_v33 = vadd.f32 %v188_v19, %v187_v35  ;;  %v2224_v35 = vsub.f32 1.0, %v1607_v14  ;;  %v1059_v19 = vpop.eup %1058  ;;  %v659_v36 = vsel %vm184_vm1, %v1568_v39, 0.0 }
  0x4b   :  { %356 = vadd.xlane.f32.xlu0 %v355_v21  ;;  %v1614_v21 = vsel %vm96_vm6, %v1589_v53, %v2221_v63  ;;  %v131_v63 = vmul.f32 0.6931472, %v1059_v19  ;;  %v1061_v54 = vpop.eup %1060  ;;  %v1647_v19 = vld [vmem:[#allocation5 + $0x58] sm:$0xff]  ;;  %v192_v7 = vsel %vm184_vm1, %v172_v62, 0.0  ;;  %v286_v62 = vsel %vm184_vm1, %v270_v32, 0.0 }
  0x4c   :  { %v191_v51 = vadd.f32 %v190_v59, %v189_v33  ;;  %v1629_v40 = vsel %vm97_vm8, %v1607_v14, %v2224_v35  ;;  %359 = vadd.xlane.f32.xlu1 %v358_v48  ;;  %v1643_v33 = vsel %vm98_vm0, %v1619_v45, %v2226_v25  ;;  %v133_v59 = vmul.f32 0.6931472, %v1061_v54  ;;  %v1651_v35 = vld [vmem:[#allocation5 + $0x60] sm:$0xff]  ;;  %v1063_v3 = vpop.eup %1062 }
  0x4d   :  { %v157_v48 = vmax.f32 %v131_v63, -100.0  ;;  %vm99_vm9 = vcmp.gt.f32.partialorder %v1647_v19, 0.5  ;;  %vm100_vm11 = vcmp.gt.f32.partialorder %v1651_v35, 0.5  ;;  %v84_v63 = vsub.f32 1.0, %v1656_v28 }
  0x4e   :  { %v158_v39 = vmax.f32 %v133_v59, -100.0  ;;  %v1678_v32 = vsel %vm99_vm9, %v1653_v0, %v83_v47  ;;  %1064 = vlog2.f32 %v1614_v21 }
  0x4f   :  { %657 = vadd.xlane.f32.xlu0 %v656_v58  ;;  %v271_v58 = vmul.f32 %v1395_v10, %v1427_v22  ;;  %v193_v10 = vadd.f32 %v192_v7, %v191_v51  ;;  %v173_v25 = vsub.f32 0.0, %v157_v48  ;;  %v1665_v51 = vsel %vm247_vm2, 0.0, %v1601_v13 }
  0x50   :  { %660 = vadd.xlane.f32.xlu1 %v659_v36  ;;  %v174_v36 = vsub.f32 0.0, %v158_v39  ;;  %v1685_v20 = vsel %vm100_vm11, %v1656_v28, %v84_v63  ;;  %v272_v22 = vmul.f32 %v1414_v16, %v1460_v34  ;;  %v464_v16 = vmul.f32 %v448_v17, %v74_v41 }
  0x51   :  { %v289_v54 = vsel %vm184_vm1, %v271_v58, 0.0  ;;  %v194_v7 = vsel %vm184_vm1, %v173_v25, 0.0  ;;  %v463_v25 = vmul.f32 %v447_v11, %v73_v31  ;;  %v662_v31 = vsel %vm184_vm1, %v1589_v53, 0.0 }
  0x52   :  { %v195_v58 = vadd.f32 %v194_v7, %v193_v10  ;;  %v196_v5 = vsel %vm184_vm1, %v174_v36, 0.0  ;;  %v455_v10 = vsub.f32 1.0, %v1601_v13  ;;  %v1712_v36 = vsel %vm248_vm3, 0.0, %v1605_v1 }
  0x53   :  { %551 = vadd.xlane.f32.xlu0 %v550_v15  ;;  %v462_v15 = vmul.f32 %v446_v8, %v72_v30  ;;  %v135_v8 = vmul.f32 0.6931472, %v1063_v3  ;;  %v361_v30 = vsel %vm184_vm1, %v1665_v51, 0.0  ;;  %v481_v7 = vsel %vm184_vm1, %v463_v25, 0.0 }
  0x54   :  { %290 = vadd.xlane.f32.xlu1 %v289_v54  ;;  %v197_v48 = vadd.f32 %v196_v5, %v195_v58  ;;  %v553_v54 = vsel %vm184_vm1, %v455_v10, 0.0  ;;  %v364_v3 = vsel %vm184_vm1, %v1712_v36, 0.0  ;;  %v456_v58 = vsub.f32 1.0, %v1605_v1 }
  0x55   :  { %v478_v59 = vsel %vm184_vm1, %v462_v15, 0.0  ;;  %v159_v39 = vmax.f32 %v135_v8, -100.0  ;;  %v292_v15 = vsel %vm184_vm1, %v272_v22, 0.0  ;;  %v484_v5 = vsel %vm184_vm1, %v464_v16, 0.0 }
  0x56   :  { %v556_v4 = vsel %vm184_vm1, %v456_v58, 0.0  ;;  %v273_v34 = vmul.f32 %v1444_v27, %v1485_v43  ;;  %v1733_v17 = vsel %vm249_vm4, 0.0, %v1647_v19  ;;  %v2229_v8 = vsub.f32 1.0, %v1485_v43 }
  0x57   :  { %287 = vadd.xlane.f32.xlu0 %v286_v62  ;;  %v175_v62 = vsub.f32 0.0, %v159_v39  ;;  %v367_v27 = vsel %vm184_vm1, %v1733_v17, 0.0  ;;  %v274_v39 = vmul.f32 %v1472_v37, %v1511_v52  ;;  %v281_v13 = vmul.f32 %v1733_v17, %v1653_v0 }
  0x58   :  { %479 = vadd.xlane.f32.xlu1 %v478_v59  ;;  %v295_v41 = vsel %vm184_vm1, %v273_v34, 0.0  ;;  %1066 = vlog2.f32 %v1629_v40 }
  0x59   :  { %v198_v6 = vsel %vm184_vm1, %v175_v62, 0.0  ;;  %v298_v43 = vsel %vm184_vm1, %v274_v39, 0.0  ;;  %v1756_v62 = vsel %vm250_vm7, 0.0, %v1651_v35  ;;  %v319_v1 = vsel %vm184_vm1, %v281_v13, 0.0 }
  0x5a   :  { %v1703_v11 = vadd.f32 %v198_v6, %v197_v48  ;;  %v457_v48 = vsub.f32 1.0, %v1647_v19  ;;  %v370_v37 = vsel %vm184_vm1, %v1756_v62, 0.0  ;;  %v458_v6 = vsub.f32 1.0, %v1651_v35 }
  0x5b   :  { %362 = vadd.xlane.f32.xlu0 %v361_v30  ;;  %v2230_v30 = vsub.f32 1.0, %v1429_v23  ;;  %v668_v23 = vsel %vm184_vm1, %v1619_v45, 0.0  ;;  %1068 = vlog2.f32 %v1643_v33  ;;  %v1065_v40 = vpop.eup %1064  ;;  %vm103_vm7 = vcmp.gt.f32.partialorder %v1816_v46, 0.5 }
  0x5c   :  { %554 = vadd.xlane.f32.xlu1 %v553_v54  ;;  %v559_v59 = vsel %vm184_vm1, %v457_v48, 0.0  ;;  %v2232_v54 = vsub.f32 1.0, %v1449_v29  ;;  %v562_v24 = vsel %vm184_vm1, %v458_v6, 0.0  ;;  %v275_v29 = vmul.f32 %v1508_v50, %v1537_v60 }
  0x5d   :  { %v465_v25 = vmul.f32 %v2230_v30, %v2229_v8  ;;  %v276_v8 = vmul.f32 %v1543_v61, %v1551_v9  ;;  %1070 = vlog2.f32 %v1678_v32  ;;  %v137_v33 = vmul.f32 0.6931472, %v1065_v40 }
  0x5e   :  { %1072 = vlog2.f32 %v1685_v20 }
  0x5f   :  { %482 = vadd.xlane.f32.xlu0 %v481_v7  ;;  %v487_v18 = vsel %vm184_vm1, %v465_v25, 0.0  ;;  %v2231_v7 = vsub.f32 1.0, %v1511_v52  ;;  %v671_v52 = vsel %vm184_vm1, %v1653_v0, 0.0  ;;  %v304_v30 = vsel %vm184_vm1, %v276_v8, 0.0 }
  0x60   :  { %293 = vadd.xlane.f32.xlu1 %v292_v15  ;;  %v1766_v15 = vld [vmem:[#allocation5 + $0x68] sm:$0xff]  ;;  %v474_v0 = vmul.f32 %v458_v6, %v84_v63 }
  0x61   :  { %v466_v22 = vmul.f32 %v2232_v54, %v2231_v7  ;;  %v1779_v16 = vsel %vm251_vm10, 0.0, %v1766_v15  ;;  %v1827_v7 = vsel %vm253_vm15, 0.0, %v1816_v46  ;;  %v307_v54 = vsel %vm184_vm1, %v1576_v57, 0.0 }
  0x62   :  { %v373_v50 = vsel %vm184_vm1, %v1779_v16, 0.0  ;;  %vm101_vm2 = vcmp.gt.f32.partialorder %v1766_v15, 0.5 }
  0x63   :  { %663 = vadd.xlane.f32.xlu0 %v662_v31  ;;  %v490_v31 = vsel %vm184_vm1, %v466_v22, 0.0  ;;  %v379_v22 = vsel %vm184_vm1, %v1827_v7, 0.0 }
  0x64   :  { %485 = vadd.xlane.f32.xlu1 %v484_v5  ;;  %v2233_v5 = vsub.f32 1.0, %v1537_v60  ;;  %v1795_v60 = vld [vmem:[#allocation5 + $0x70] sm:$0xff] }
  0x65   :  { %v1804_v25 = vsel %vm252_vm12, 0.0, %v1795_v60  ;;  %v460_v39 = vsub.f32 1.0, %v1795_v60  ;;  %vm102_vm3 = vcmp.gt.f32.partialorder %v1795_v60, 0.5  ;;  %v160_v60 = vmax.f32 %v137_v33, -100.0 }
  0x67   :  { %365 = vadd.xlane.f32.xlu0 %v364_v3  ;;  %v301_v3 = vsel %vm184_vm1, %v275_v29, 0.0  ;;  %v278_v29 = vmul.f32 %v1595_v49, %v1589_v53  ;;  %v279_v49 = vmul.f32 %v1665_v51, %v1607_v14 }
  0x68   :  { %666 = vadd.xlane.f32.xlu1 %v665_v12  ;;  %v459_v12 = vsub.f32 1.0, %v1766_v15 }
  0x6b   :  { %557 = vadd.xlane.f32.xlu0 %v556_v4  ;;  %v2234_v4 = vsub.f32 1.0, %v1487_v44  ;;  %v674_v44 = vsel %vm184_vm1, %v1656_v28, 0.0 }
  0x6c   :  { %368 = vadd.xlane.f32.xlu1 %v367_v27  ;;  %v2235_v27 = vsub.f32 1.0, %v1551_v9 }
  0x6d   :  { %v467_v34 = vmul.f32 %v2234_v4, %v2233_v5  ;;  %v1850_v4 = vld [vmem:[#allocation2 + $0x78] sm:$0xff] }
  0x6f   :  { %296 = vadd.xlane.f32.xlu0 %v295_v41  ;;  %v493_v38 = vsel %vm184_vm1, %v467_v34, 0.0  ;;  %v565_v41 = vsel %vm184_vm1, %v459_v12, 0.0 }
  0x70   :  { %560 = vadd.xlane.f32.xlu1 %v559_v59  ;;  %v376_v59 = vsel %vm184_vm1, %v1804_v25, 0.0 }
  0x73   :  { %488 = vadd.xlane.f32.xlu0 %v487_v18  ;;  %v2236_v18 = vsub.f32 1.0, %v1519_v55  ;;  %v568_v55 = vsel %vm184_vm1, %v460_v39, 0.0 }
  0x74   :  { %299 = vadd.xlane.f32.xlu1 %v298_v43  ;;  %v1814_v43 = vld [vmem:[#allocation2 + $0x68] sm:$0xff] }
  0x75   :  { %v468_v61 = vmul.f32 %v2236_v18, %v2235_v27  ;;  %v677_v9 = vsel %vm184_vm1, %v1814_v43, 0.0  ;;  %v514_v18 = vsel %vm184_vm1, %v474_v0, 0.0 }
  0x77   :  { %669 = vadd.xlane.f32.xlu0 %v668_v23  ;;  %v496_v23 = vsel %vm184_vm1, %v468_v61, 0.0 }
  0x78   :  { %491 = vadd.xlane.f32.xlu1 %v490_v31  ;;  %v499_v31 = vsel %vm184_vm1, %v1585_v42, 0.0  ;;  %v310_v42 = vsel %vm184_vm1, %v278_v29, 0.0 }
  0x7b   :  { %371 = vadd.xlane.f32.xlu0 %v370_v37  ;;  %v461_v37 = vsub.f32 1.0, %v1816_v46 }
  0x7c   :  { %672 = vadd.xlane.f32.xlu1 %v671_v52  ;;  %v2237_v52 = vsub.f32 1.0, %v1589_v53  ;;  %v313_v53 = vsel %vm184_vm1, %v279_v49, 0.0 }
  0x7d   :  { %v571_v56 = vsel %vm184_vm1, %v461_v37, 0.0 }
  0x7f   :  { %563 = vadd.xlane.f32.xlu0 %v562_v24  ;;  %v1839_v24 = vld [vmem:[#allocation2 + $0x70] sm:$0xff] }
  0x80   :  { %374 = vadd.xlane.f32.xlu1 %v373_v50  ;;  %v680_v57 = vsel %vm184_vm1, %v1839_v24, 0.0  ;;  %v683_v50 = vsel %vm184_vm1, %v1850_v4, 0.0  ;;  %v86_v35 = vsub.f32 1.0, %v1839_v24  ;;  %v284_v61 = vmul.f32 %v1804_v25, %v1839_v24 }
  0x83   :  { %302 = vadd.xlane.f32.xlu0 %v301_v3  ;;  %v2238_v3 = vsub.f32 1.0, %v1581_v26 }
  0x84   :  { %566 = vadd.xlane.f32.xlu1 %v565_v41  ;;  %v280_v41 = vmul.f32 %v1712_v36, %v1619_v45  ;;  %v473_v36 = vmul.f32 %v457_v48, %v83_v47  ;;  %v85_v47 = vsub.f32 1.0, %v1814_v43 }
  0x85   :  { %v470_v5 = vmul.f32 %v2238_v3, %v2237_v52 }
  0x86   :  { %v511_v17 = vsel %vm184_vm1, %v473_v36, 0.0  ;;  %v117_v3 = vsel %vm101_vm2, %v1814_v43, %v85_v47 }
  0x87   :  { %494 = vadd.xlane.f32.xlu0 %v493_v38  ;;  %v502_v34 = vsel %vm184_vm1, %v470_v5, 0.0  ;;  %v2239_v38 = vsub.f32 1.0, %v1607_v14  ;;  %v316_v14 = vsel %vm184_vm1, %v280_v41, 0.0  ;;  %v118_v5 = vsel %vm102_vm3, %v1839_v24, %v86_v35 }
  0x88   :  { %305 = vadd.xlane.f32.xlu1 %v304_v30  ;;  %1074 = vlog2.f32 %v117_v3 }
  0x89   :  { %v471_v26 = vmul.f32 %v455_v10, %v2239_v38  ;;  %1076 = vlog2.f32 %v118_v5 }
  0x8b   :  { %675 = vadd.xlane.f32.xlu0 %v674_v44  ;;  %v505_v8 = vsel %vm184_vm1, %v471_v26, 0.0  ;;  %v2240_v44 = vsub.f32 1.0, %v1619_v45  ;;  %v282_v45 = vmul.f32 %v1756_v62, %v1656_v28  ;;  %v283_v62 = vmul.f32 %v1779_v16, %v1814_v43 }
  0x8c   :  { %497 = vadd.xlane.f32.xlu1 %v496_v23  ;;  %v475_v28 = vmul.f32 %v459_v12, %v85_v47  ;;  %v476_v23 = vmul.f32 %v460_v39, %v86_v35  ;;  %v87_v12 = vsub.f32 1.0, %v1850_v4  ;;  %v176_v26 = vsub.f32 0.0, %v160_v60 }
  0x8d   :  { %v472_v51 = vmul.f32 %v456_v58, %v2240_v44  ;;  %v322_v48 = vsel %vm184_vm1, %v282_v45, 0.0  ;;  %v325_v6 = vsel %vm184_vm1, %v283_v62, 0.0 }
  0x8e   :  { %v517_v16 = vsel %vm184_vm1, %v475_v28, 0.0  ;;  %v119_v38 = vsel %vm103_vm7, %v1850_v4, %v87_v12 }
  0x8f   :  { %377 = vadd.xlane.f32.xlu0 %v376_v59  ;;  %v508_v10 = vsel %vm184_vm1, %v472_v51, 0.0 }
  0x90   :  { %678 = vadd.xlane.f32.xlu1 %v677_v9  ;;  %v328_v9 = vsel %vm184_vm1, %v284_v61, 0.0 }
  0x93   :  { %569 = vadd.xlane.f32.xlu0 %v568_v55 }
  0x94   :  { %380 = vadd.xlane.f32.xlu1 %v379_v22  ;;  %v520_v22 = vsel %vm184_vm1, %v476_v23, 0.0 }
  0x97   :  { %308 = vadd.xlane.f32.xlu0 %v307_v54  ;;  %v285_v54 = vmul.f32 %v1827_v7, %v1850_v4 }
  0x98   :  { %572 = vadd.xlane.f32.xlu1 %v571_v56 }
  0x99   :  { %v331_v21 = vsel %vm184_vm1, %v285_v54, 0.0 }
  0x9b   :  { %500 = vadd.xlane.f32.xlu0 %v499_v31  ;;  %v477_v31 = vmul.f32 %v461_v37, %v87_v12 }
  0x9c   :  { %311 = vadd.xlane.f32.xlu1 %v310_v42 }
  0x9d   :  { %v523_v29 = vsel %vm184_vm1, %v477_v31, 0.0 }
  0x9f   :  { %681 = vadd.xlane.f32.xlu0 %v680_v57 }
  0xa0   :  { %684 = vadd.xlane.f32.xlu1 %v683_v50 }
  0xa3   :  { %503 = vadd.xlane.f32.xlu0 %v502_v34  ;;  %v1067_v34 = vpop.eup %1066 }
  0xa4   :  { %506 = vadd.xlane.f32.xlu1 %v505_v8  ;;  %v1069_v32 = vpop.eup %1068  ;;  %v139_v49 = vmul.f32 0.6931472, %v1067_v34 }
  0xa5   :  { %v141_v50 = vmul.f32 0.6931472, %v1069_v32  ;;  %v1071_v46 = vpop.eup %1070 }
  0xa6   :  { %v161_v41 = vmax.f32 %v139_v49, -100.0  ;;  %v143_v4 = vmul.f32 0.6931472, %v1071_v46  ;;  %v1073_v36 = vpop.eup %1072 }
  0xa7   :  { %314 = vadd.xlane.f32.xlu0 %v313_v53  ;;  %v162_v13 = vmax.f32 %v141_v50, -100.0  ;;  %v1075_v0 = vpop.eup %1074 }
  0xa8   :  { %509 = vadd.xlane.f32.xlu1 %v508_v10  ;;  %v200_v10 = vsel %vm184_vm1, %v176_v26, 0.0  ;;  %v163_v62 = vmax.f32 %v143_v4, -100.0  ;;  %v147_v61 = vmul.f32 0.6931472, %v1075_v0 }
  0xa9   :  { %v1882_v58 = vpop.xlane.xlu1 %527  ;;  %v178_v47 = vsub.f32 0.0, %v162_v13 }
  0xaa   :  { %vm574_vm14 = vcmp.gt.f32.partialorder %v1882_v58, 0.0  ;;  %v179_v23 = vsub.f32 0.0, %v163_v62 }
  0xab   :  { %317 = vadd.xlane.f32.xlu0 %v316_v14  ;;  %v590_v45 = vsel %vm574_vm14, %v1882_v58, 1.0  ;;  %v204_v12 = vsel %vm184_vm1, %v178_v47, 0.0 }
  0xac   :  { %v1877_v30 = vpop.xlane.xlu0 %335  ;;  %512 = vadd.xlane.f32.xlu1 %v511_v17  ;;  %v206_v31 = vsel %vm184_vm1, %v179_v23, 0.0 }
  0xad   :  { %v1895_v27 = vpop.xlane.xlu1 %530  ;;  %vm382_vm4 = vcmp.gt.f32.partialorder %v1877_v30, 0.0 }
  0xae   :  { %v398_v20 = vsel %vm382_vm4, %v1877_v30, 1.0  ;;  %v177_v30 = vsub.f32 0.0, %v161_v41  ;;  %vm575_vm15 = vcmp.gt.f32.partialorder %v1895_v27, 0.0 }
  0xaf   :  { %320 = vadd.xlane.f32.xlu0 %v319_v1  ;;  %1078 = vrcp.f32 %v398_v20  ;;  %v591_v28 = vsel %vm575_vm15, %v1895_v27, 1.0 }
  0xb0   :  { %v1890_v19 = vpop.xlane.xlu0 %338  ;;  %515 = vadd.xlane.f32.xlu1 %v514_v18  ;;  %1080 = vlog2.f32 %v119_v38  ;;  %v1077_v18 = vpop.eup %1076  ;;  %v202_v58 = vsel %vm184_vm1, %v177_v30, 0.0 }
  0xb1   :  { %v1906_v59 = vpop.xlane.xlu1 %533  ;;  %vm383_vm10 = vcmp.gt.f32.partialorder %v1890_v19, 0.0  ;;  %v149_v27 = vmul.f32 0.6931472, %v1077_v18 }
  0xb2   :  { %v399_v53 = vsel %vm383_vm10, %v1890_v19, 1.0  ;;  %v201_v19 = vadd.f32 %v200_v10, %v1703_v11  ;;  %vm576_vm8 = vcmp.gt.f32.partialorder %v1906_v59, 0.0 }
  0xb3   :  { %323 = vadd.xlane.f32.xlu0 %v322_v48  ;;  %1082 = vrcp.f32 %v399_v53  ;;  %v145_v48 = vmul.f32 0.6931472, %v1073_v36  ;;  %v166_v3 = vmax.f32 %v149_v27, -100.0  ;;  %v592_v60 = vsel %vm576_vm8, %v1906_v59, 1.0 }
  0xb4   :  { %v1901_v63 = vpop.xlane.xlu0 %341  ;;  %518 = vadd.xlane.f32.xlu1 %v517_v16  ;;  %v203_v11 = vadd.f32 %v202_v58, %v201_v19  ;;  %vm974_vm8 = vcmask 7168  }
  0xb5   :  { %v643_v25 = vpop.xlane.xlu1 %642  ;;  %vm384_vm5 = vcmp.gt.f32.partialorder %v1901_v63, 0.0  ;;  %v164_v16 = vmax.f32 %v145_v48, -100.0  ;;  %v182_v20 = vsub.f32 0.0, %v166_v3 }
  0xb6   :  { %vm687_vm13 = vcmp.gt.f32.partialorder %v643_v25, 0.0 }
  0xb7   :  { %326 = vadd.xlane.f32.xlu0 %v325_v6  ;;  %v703_v51 = vsel %vm687_vm13, %v643_v25, 1.0  ;;  %v180_v25 = vsub.f32 0.0, %v164_v16  ;;  %v212_v13 = vsel %vm184_vm1, %v182_v20, 0.0 }
  0xb8   :  { %v640_v55 = vpop.xlane.xlu0 %639  ;;  %521 = vadd.xlane.f32.xlu1 %v520_v22  ;;  %v205_v22 = vadd.f32 %v204_v12, %v203_v11 }
  0xb9   :  { %v1923_v56 = vpop.xlane.xlu1 %536  ;;  %vm686_vm12 = vcmp.gt.f32.partialorder %v640_v55, 0.0 }
  0xba   :  { %v702_v8 = vsel %vm686_vm12, %v640_v55, 1.0  ;;  %v400_v55 = vsel %vm384_vm5, %v1901_v63, 1.0  ;;  %v207_v34 = vadd.f32 %v206_v31, %v205_v22  ;;  %v208_v63 = vsel %vm184_vm1, %v180_v25, 0.0 }
  0xbb   :  { %329 = vadd.xlane.f32.xlu0 %v328_v9  ;;  %1084 = vrcp.f32 %v702_v8  ;;  %v165_v9 = vmax.f32 %v147_v61, -100.0  ;;  %vm577_vm11 = vcmp.gt.f32.partialorder %v1923_v56, 0.0 }
  0xbc   :  { %v1920_v39 = vpop.xlane.xlu0 %344  ;;  %524 = vadd.xlane.f32.xlu1 %v523_v29  ;;  %1086 = vrcp.f32 %v703_v51  ;;  %v209_v26 = vadd.f32 %v208_v63, %v207_v34  ;;  %v593_v16 = vsel %vm577_vm11, %v1923_v56, 1.0 }
  0xbd   :  { %v1929_v57 = vpop.xlane.xlu1 %347  ;;  %1088 = vrcp.f32 %v590_v45  ;;  %v181_v33 = vsub.f32 0.0, %v165_v9  ;;  %vm385_vm0 = vcmp.gt.f32.partialorder %v1920_v39, 0.0 }
  0xbe   :  { %1090 = vrcp.f32 %v591_v28  ;;  %v401_v48 = vsel %vm385_vm0, %v1920_v39, 1.0  ;;  %vm386_vm2 = vcmp.gt.f32.partialorder %v1929_v57, 0.0 }
  0xbf   :  { %332 = vadd.xlane.f32.xlu0 %v331_v21  ;;  %v1079_v21 = vpop.eup %1078  ;;  %1092 = vrcp.f32 %v400_v55  ;;  %v402_v11 = vsel %vm386_vm2, %v1929_v57, 1.0 }
  0xc0   :  { %v1927_v7 = vpop.xlane.xlu0 %645  ;;  %v1081_v5 = vpop.eup %1080 }
  0xc1   :  { %v1936_v52 = vpop.xlane.xlu1 %648  ;;  %vm688_vm6 = vcmp.gt.f32.partialorder %v1927_v7, 0.0  ;;  %v1083_v32 = vpop.eup %1082  ;;  %v151_v49 = vmul.f32 0.6931472, %v1081_v5 }
  0xc2   :  { %v704_v29 = vsel %vm688_vm6, %v1927_v7, 1.0  ;;  %v210_v7 = vsel %vm184_vm1, %v181_v33, 0.0  ;;  %vm689_vm9 = vcmp.gt.f32.partialorder %v1936_v52, 0.0 }
  0xc3   :  { %1094 = vrcp.f32 %v704_v29  ;;  %v167_v51 = vmax.f32 %v151_v49, -100.0  ;;  %v211_v36 = vadd.f32 %v210_v7, %v209_v26  ;;  %v705_v28 = vsel %vm689_vm9, %v1936_v52, 1.0 }
  0xc4   :  { %v1933_v37 = vpop.xlane.xlu0 %539  ;;  %1096 = vrcp.f32 %v592_v60 }
  0xc5   :  { %v1943_v15 = vpop.xlane.xlu1 %542  ;;  %v183_v59 = vsub.f32 0.0, %v167_v51  ;;  %v213_v45 = vadd.f32 %v212_v13, %v211_v36  ;;  %vm578_vm3 = vcmp.gt.f32.partialorder %v1933_v37, 0.0 }
  0xc6   :  { %v594_v52 = vsel %vm578_vm3, %v1933_v37, 1.0  ;;  %vm579_vm4 = vcmp.gt.f32.partialorder %v1943_v15, 0.0 }
  0xc7   :  { %v214_v19 = vsel %vm184_vm1, %v183_v59, 0.0  ;;  %v595_v37 = vsel %vm579_vm4, %v1943_v15, 1.0 }
  0xc8   :  { %v1941_v42 = vpop.xlane.xlu0 %350  ;;  %v1085_v50 = vpop.eup %1084  ;;  %v215_v18 = vadd.f32 %v214_v19, %v213_v45 }
  0xc9   :  { %v1951_v24 = vpop.xlane.xlu1 %353  ;;  %v1087_v53 = vpop.eup %1086  ;;  %vm387_vm1 = vcmp.gt.f32.partialorder %v1941_v42, 0.0 }
  0xca   :  { %v1089_v0 = vpop.eup %1088  ;;  %216 = vadd.xlane.f32.xlu0 %v215_v18  ;;  %v403_v55 = vsel %vm387_vm1, %v1941_v42, 1.0  ;;  %vm388_vm10 = vcmp.gt.f32.partialorder %v1951_v24, 0.0 }
  0xcb   :  { %v1091_v58 = vpop.eup %1090  ;;  %v404_v15 = vsel %vm388_vm10, %v1951_v24, 1.0 }
  0xcc   :  { %v1948_v43 = vpop.xlane.xlu0 %651  ;;  %v1093_v12 = vpop.eup %1092 }
  0xcd   :  { %v1957_v14 = vpop.xlane.xlu1 %654  ;;  %vm690_vm7 = vcmp.gt.f32.partialorder %v1948_v43, 0.0 }
  0xce   :  { %v706_v33 = vsel %vm690_vm7, %v1948_v43, 1.0  ;;  %vm691_vm13 = vcmp.gt.f32.partialorder %v1957_v14, 0.0 }
  0xcf   :  { %v707_v43 = vsel %vm691_vm13, %v1957_v14, 1.0 }
  0xd0   :  { %v1955_v44 = vpop.xlane.xlu0 %545  ;;  %v1095_v9 = vpop.eup %1094 }
  0xd1   :  { %v1965_v17 = vpop.xlane.xlu1 %548  ;;  %v1097_v31 = vpop.eup %1096  ;;  %vm580_vm12 = vcmp.gt.f32.partialorder %v1955_v44, 0.0 }
  0xd2   :  { %vm581_vm15 = vcmp.gt.f32.partialorder %v1965_v17, 0.0 }
  0xd4   :  { %v1961_v1 = vpop.xlane.xlu0 %356 }
  0xd5   :  { %v1973_v6 = vpop.xlane.xlu1 %359  ;;  %vm389_vm14 = vcmp.gt.f32.partialorder %v1961_v1, 0.0 }
  0xd6   :  { %vm390_vm6 = vcmp.gt.f32.partialorder %v1973_v6, 0.0 }
  0xd8   :  { %v1970_v35 = vpop.xlane.xlu0 %657 }
  0xd9   :  { %v1983_v40 = vpop.xlane.xlu1 %660  ;;  %vm692_vm5 = vcmp.gt.f32.partialorder %v1970_v35, 0.0 }
  0xda   :  { %vm693_vm9 = vcmp.gt.f32.partialorder %v1983_v40, 0.0 }
  0xdc   :  { %v1979_v54 = vpop.xlane.xlu0 %551 }
  0xdd   :  { %v291_v8 = vpop.xlane.xlu1 %290  ;;  %vm582_vm0 = vcmp.gt.f32.partialorder %v1979_v54, 0.0 }
  0xde   :  { %v417_v10 = vmul.f32 %v1083_v32, %v291_v8  ;;  %v721_v4 = vmul.f32 %v1087_v53, %v291_v8  ;;  %v596_v32 = vsel %vm580_vm12, %v1955_v44, 1.0  ;;  %v405_v44 = vsel %vm389_vm14, %v1961_v1, 1.0 }
  0xe0   :  { %v288_v38 = vpop.xlane.xlu0 %287 }
  0xe1   :  { %v415_v46 = vmul.f32 %v1079_v21, %v288_v38  ;;  %v719_v41 = vmul.f32 %v1085_v50, %v288_v38  ;;  %v480_v47 = vpop.xlane.xlu1 %479 }
  0xe2   :  { %v607_v62 = vmul.f32 %v1089_v0, %v480_v47 }
  0xe3   :  { %1098 = vlog2.f32 %v415_v46 }
  0xe4   :  { %1100 = vlog2.f32 %v719_v41  ;;  %v1991_v30 = vpop.xlane.xlu0 %362 }
  0xe5   :  { %1102 = vlog2.f32 %v417_v10  ;;  %v2001_v23 = vpop.xlane.xlu1 %554  ;;  %vm391_vm11 = vcmp.gt.f32.partialorder %v1991_v30, 0.0 }
  0xe6   :  { %1104 = vlog2.f32 %v721_v4  ;;  %vm583_vm2 = vcmp.gt.f32.partialorder %v2001_v23, 0.0 }
  0xe7   :  { %1106 = vlog2.f32 %v607_v62 }
  0xe8   :  { %v483_v61 = vpop.xlane.xlu0 %482  ;;  %1108 = vrcp.f32 %v401_v48 }
  0xe9   :  { %v609_v39 = vmul.f32 %v1091_v58, %v483_v61  ;;  %1110 = vrcp.f32 %v705_v28  ;;  %v294_v56 = vpop.xlane.xlu1 %293 }
  0xea   :  { %v419_v25 = vmul.f32 %v1093_v12, %v294_v56  ;;  %v723_v22 = vmul.f32 %v1095_v9, %v294_v56  ;;  %v708_v56 = vsel %vm692_vm5, %v1970_v35, 1.0 }
  0xeb   :  { %1112 = vlog2.f32 %v609_v39  ;;  %v597_v39 = vsel %vm581_vm15, %v1965_v17, 1.0 }
  0xec   :  { %1114 = vrcp.f32 %v593_v16  ;;  %v2006_v27 = vpop.xlane.xlu0 %663 }
  0xed   :  { %1116 = vrcp.f32 %v402_v11  ;;  %v486_v29 = vpop.xlane.xlu1 %485  ;;  %vm694_vm3 = vcmp.gt.f32.partialorder %v2006_v27, 0.0 }
  0xee   :  { %1118 = vrcp.f32 %v594_v52  ;;  %v611_v34 = vmul.f32 %v1097_v31, %v486_v29 }
  0xef   :  { %1120 = vrcp.f32 %v403_v55 }
  0xf0   :  { %v1099_v57 = vpop.eup %1098  ;;  %1122 = vlog2.f32 %v419_v25  ;;  %v2012_v42 = vpop.xlane.xlu0 %365 }
  0xf1   :  { %v1101_v21 = vpop.eup %1100  ;;  %1124 = vlog2.f32 %v723_v22  ;;  %v751_v5 = vmul.f32 0.6931472, %v1099_v57  ;;  %v2023_v38 = vpop.xlane.xlu1 %666  ;;  %vm392_vm1 = vcmp.gt.f32.partialorder %v2012_v42, 0.0 }
  0xf2   :  { %v1103_v3 = vpop.eup %1102  ;;  %1126 = vrcp.f32 %v595_v37  ;;  %v895_v60 = vmul.f32 0.6931472, %v1101_v21  ;;  %vm695_vm7 = vcmp.gt.f32.partialorder %v2023_v38, 0.0 }
  0xf3   :  { %v1105_v63 = vpop.eup %1104  ;;  %1128 = vlog2.f32 %v611_v34  ;;  %v753_v50 = vmul.f32 0.6931472, %v1103_v3  ;;  %v782_v7 = vmax.f32 %v751_v5, -100.0  ;;  %v406_v3 = vsel %vm390_vm6, %v1973_v6, 1.0 }
  0xf4   :  { %v2020_v49 = vpop.xlane.xlu0 %557  ;;  %v1107_v20 = vpop.eup %1106  ;;  %1130 = vrcp.f32 %v706_v33  ;;  %v897_v46 = vmul.f32 0.6931472, %v1105_v63  ;;  %v926_v8 = vmax.f32 %v895_v60, -100.0 }
  0xf5   :  { %v1109_v26 = vpop.eup %1108  ;;  %1132 = vrcp.f32 %v404_v15  ;;  %v815_v24 = vmul.f32 0.6931472, %v1107_v20  ;;  %v783_v4 = vmax.f32 %v753_v50, -100.0  ;;  %v2026_v45 = vpop.xlane.xlu1 %368  ;;  %v798_v47 = vsub.f32 0.0, %v782_v7 }
  0xf6   :  { %v1111_v53 = vpop.eup %1110  ;;  %1134 = vrcp.f32 %v596_v32  ;;  %v927_v48 = vmax.f32 %v897_v46, -100.0  ;;  %v942_v28 = vsub.f32 0.0, %v926_v8  ;;  %vm584_vm4 = vcmp.gt.f32.partialorder %v2020_v49, 0.0 }
  0xf7   :  { %1136 = vrcp.f32 %v707_v43  ;;  %v846_v51 = vmax.f32 %v815_v24, -100.0  ;;  %v799_v11 = vsub.f32 0.0, %v783_v4  ;;  %v407_v4 = vsel %vm391_vm11, %v1991_v30, 1.0 }
  0xf8   :  { %v1113_v41 = vpop.eup %1112  ;;  %v297_v13 = vpop.xlane.xlu0 %296  ;;  %1138 = vrcp.f32 %v405_v44  ;;  %v943_v31 = vsub.f32 0.0, %v927_v48  ;;  %v598_v44 = vsel %vm582_vm0, %v1979_v54, 1.0  ;;  %v710_v30 = vsel %vm694_vm3, %v2006_v27, 1.0 }
  0xf9   :  { %v1115_v10 = vpop.eup %1114  ;;  %v817_v14 = vmul.f32 0.6931472, %v1113_v41  ;;  %v421_v36 = vmul.f32 %v1109_v26, %v297_v13  ;;  %v725_v59 = vmul.f32 %v1111_v53, %v297_v13  ;;  %v862_v19 = vsub.f32 0.0, %v846_v51  ;;  %v2033_v55 = vpop.xlane.xlu1 %560 }
  0xfa   :  { %v1117_v0 = vpop.eup %1116  ;;  %v408_v27 = vsel %vm392_vm1, %v2012_v42, 1.0  ;;  %vm393_vm10 = vcmp.gt.f32.partialorder %v2026_v45, 0.0  ;;  %vm585_vm12 = vcmp.gt.f32.partialorder %v2033_v55, 0.0 }
  0xfb   :  { %v1119_v1 = vpop.eup %1118  ;;  %v847_v62 = vmax.f32 %v817_v14, -100.0  ;;  %1140 = vlog2.f32 %v421_v36  ;;  %v878_v58 = vadd.f32 %v862_v19, %v798_v47  ;;  %v599_v47 = vsel %vm583_vm2, %v2001_v23, 1.0 }
  0xfc   :  { %v2030_v18 = vpop.eup %1120  ;;  %1142 = vlog2.f32 %v725_v59  ;;  %v489_v61 = vpop.xlane.xlu0 %488 }
  0xfd   :  { %v1123_v16 = vpop.eup %1122  ;;  %v863_v52 = vsub.f32 0.0, %v847_v62  ;;  %v613_v12 = vmul.f32 %v1115_v10, %v489_v61  ;;  %v958_v25 = vadd.f32 %v942_v28, %v878_v58  ;;  %v300_v33 = vpop.xlane.xlu1 %299  ;;  %v709_v10 = vsel %vm693_vm9, %v1983_v40, 1.0 }
  0xfe   :  { %v1125_v9 = vpop.eup %1124  ;;  %v755_v22 = vmul.f32 0.6931472, %v1123_v16  ;;  %v423_v63 = vmul.f32 %v1117_v0, %v300_v33 }
  0xff   :  { %v879_v57 = vadd.f32 %v863_v52, %v799_v11  ;;  %1144 = vlog2.f32 %v613_v12  ;;  %v2039_v37 = vpop.eup %1126  ;;  %v899_v17 = vmul.f32 0.6931472, %v1125_v9  ;;  %v975_v60 = vsel %vm974_vm8, %v958_v25, 0.0 }
 0x100   :  { %1146 = vrcp.f32 %v597_v39  ;;  %v2041_v21 = vpop.xlane.xlu0 %669  ;;  %v1129_v29 = vpop.eup %1128  ;;  %v784_v34 = vmax.f32 %v755_v22, -100.0 }
 0x101   :  { %1148 = vrcp.f32 %v708_v56  ;;  %v959_v35 = vadd.f32 %v943_v31, %v879_v57  ;;  %v1131_v5 = vpop.eup %1130  ;;  %v819_v15 = vmul.f32 0.6931472, %v1129_v29  ;;  %v928_v26 = vmax.f32 %v899_v17, -100.0  ;;  %v492_v46 = vpop.xlane.xlu1 %491 }
 0x102   :  { %v2046_v32 = vpop.eup %1132  ;;  %v727_v43 = vmul.f32 %v1131_v5, %v300_v33  ;;  %1150 = vlog2.f32 %v423_v63  ;;  %v800_v41 = vsub.f32 0.0, %v784_v34  ;;  %v615_v51 = vmul.f32 %v1119_v1, %v492_v46 }
 0x103   :  { %v976_v20 = vsel %vm974_vm8, %v959_v35, 0.0  ;;  %v2051_v6 = vpop.eup %1134  ;;  %v848_v7 = vmax.f32 %v819_v15, -100.0  ;;  %v944_v54 = vsub.f32 0.0, %v928_v26  ;;  %v600_v57 = vsel %vm584_vm4, %v2020_v49, 1.0 }
 0x104   :  { %v977_v50 = vadd.f32 %v976_v20, %v975_v60  ;;  %v2053_v24 = vpop.xlane.xlu0 %371  ;;  %v1137_v53 = vpop.eup %1136  ;;  %1152 = vlog2.f32 %v727_v43  ;;  %v711_v35 = vsel %vm695_vm7, %v2023_v38, 1.0  ;;  %vm696_vm13 = vcmp.gt.f32.partialorder %v2041_v21, 0.0 }
 0x105   :  { %v864_v8 = vsub.f32 0.0, %v848_v7  ;;  %v2059_v13 = vpop.eup %1138  ;;  %1154 = vrcp.f32 %v406_v3  ;;  %v2073_v40 = vpop.xlane.xlu1 %672  ;;  %vm394_vm14 = vcmp.gt.f32.partialorder %v2053_v24, 0.0 }
 0x106   :  { %1156 = vlog2.f32 %v615_v51  ;;  %vm697_vm5 = vcmp.gt.f32.partialorder %v2073_v40, 0.0 }
 0x107   :  { %v880_v36 = vadd.f32 %v864_v8, %v800_v41  ;;  %1158 = vrcp.f32 %v598_v44 }
 0x108   :  { %v1141_v14 = vpop.eup %1140  ;;  %v2068_v59 = vpop.xlane.xlu0 %563  ;;  %1160 = vrcp.f32 %v709_v10 }
 0x109   :  { %v1143_v0 = vpop.eup %1142  ;;  %v757_v19 = vmul.f32 0.6931472, %v1141_v14  ;;  %v960_v1 = vadd.f32 %v944_v54, %v880_v36  ;;  %1162 = vrcp.f32 %v407_v4  ;;  %v2081_v52 = vpop.xlane.xlu1 %374  ;;  %vm586_vm15 = vcmp.gt.f32.partialorder %v2068_v59, 0.0 }
 0x10a   :  { %v901_v48 = vmul.f32 0.6931472, %v1143_v0  ;;  %1164 = vrcp.f32 %v599_v47  ;;  %vm395_vm6 = vcmp.gt.f32.partialorder %v2081_v52, 0.0 }
 0x10b   :  { %v978_v28 = vsel %vm974_vm8, %v960_v1, 0.0  ;;  %v785_v23 = vmax.f32 %v757_v19, -100.0  ;;  %1166 = vrcp.f32 %v710_v30  ;;  %v712_v19 = vsel %vm696_vm13, %v2041_v21, 1.0 }
 0x10c   :  { %v1145_v62 = vpop.eup %1144  ;;  %v303_v58 = vpop.xlane.xlu0 %302  ;;  %v979_v16 = vadd.f32 %v978_v28, %v977_v50  ;;  %v929_v56 = vmax.f32 %v901_v48, -100.0  ;;  %v410_v1 = vsel %vm394_vm14, %v2053_v24, 1.0  ;;  %v602_v28 = vsel %vm586_vm15, %v2068_v59, 1.0 }
 0x10d   :  { %v2078_v61 = vpop.eup %1146  ;;  %v821_v39 = vmul.f32 0.6931472, %v1145_v62  ;;  %v425_v11 = vmul.f32 %v2030_v18, %v303_v58  ;;  %v729_v9 = vmul.f32 %v1137_v53, %v303_v58  ;;  %v801_v18 = vsub.f32 0.0, %v785_v23  ;;  %v2088_v3 = vpop.xlane.xlu1 %566 }
 0x10e   :  { %v1149_v12 = vpop.eup %1148  ;;  %v945_v5 = vsub.f32 0.0, %v929_v56  ;;  %v713_v24 = vsel %vm697_vm5, %v2073_v40, 1.0  ;;  %v411_v40 = vsel %vm395_vm6, %v2081_v52, 1.0  ;;  %vm587_vm0 = vcmp.gt.f32.partialorder %v2088_v3, 0.0 }
 0x10f   :  { %v849_v25 = vmax.f32 %v821_v39, -100.0  ;;  %1168 = vlog2.f32 %v425_v11  ;;  %v1151_v31 = vpop.eup %1150 }
 0x110   :  { %1170 = vlog2.f32 %v729_v9  ;;  %v495_v22 = vpop.xlane.xlu0 %494  ;;  %v759_v33 = vmul.f32 0.6931472, %v1151_v31 }
 0x111   :  { %v865_v17 = vsub.f32 0.0, %v849_v25  ;;  %v617_v29 = vmul.f32 %v2039_v37, %v495_v22  ;;  %v1153_v42 = vpop.eup %1152  ;;  %1172 = vrcp.f32 %v408_v27  ;;  %v409_v37 = vsel %vm393_vm10, %v2026_v45, 1.0  ;;  %v306_v43 = vpop.xlane.xlu1 %305 }
 0x112   :  { %v2092_v15 = vpop.eup %1154  ;;  %v903_v49 = vmul.f32 0.6931472, %v1153_v42  ;;  %v786_v38 = vmax.f32 %v759_v33, -100.0  ;;  %v427_v7 = vmul.f32 %v2046_v32, %v306_v43  ;;  %v731_v46 = vmul.f32 %v1149_v12, %v306_v43 }
 0x113   :  { %v881_v34 = vadd.f32 %v865_v17, %v801_v18  ;;  %1174 = vlog2.f32 %v617_v29  ;;  %v1157_v60 = vpop.eup %1156  ;;  %v601_v32 = vsel %vm585_vm12, %v2033_v55, 1.0  ;;  %vm1018_vm12 = vcmp.eq.s32.totalorder %v1366_v2, 1 }
 0x114   :  { %1176 = vrcp.f32 %v600_v57  ;;  %v2094_v63 = vpop.xlane.xlu0 %675  ;;  %v2097_v50 = vpop.eup %1158  ;;  %v823_v26 = vmul.f32 0.6931472, %v1157_v60  ;;  %v930_v8 = vmax.f32 %v903_v49, -100.0  ;;  %v802_v54 = vsub.f32 0.0, %v786_v38 }
 0x115   :  { %1178 = vrcp.f32 %v711_v35  ;;  %v961_v20 = vadd.f32 %v945_v5, %v881_v34  ;;  %v1161_v53 = vpop.eup %1160  ;;  %v498_v14 = vpop.xlane.xlu1 %497  ;;  %vm698_vm9 = vcmp.gt.f32.partialorder %v2094_v63, 0.0  ;;  %v603_v5 = vsel %vm587_vm0, %v2088_v3, 1.0 }
 0x116   :  { %v2104_v41 = vpop.eup %1162  ;;  %v850_v51 = vmax.f32 %v823_v26, -100.0  ;;  %1180 = vlog2.f32 %v427_v7  ;;  %v619_v0 = vmul.f32 %v2051_v6, %v498_v14  ;;  %v946_v30 = vsub.f32 0.0, %v930_v8 }
 0x117   :  { %v980_v44 = vsel %vm974_vm8, %v961_v20, 0.0  ;;  %v2108_v4 = vpop.eup %1164  ;;  %1182 = vlog2.f32 %v731_v46  ;;  %v714_v60 = vsel %vm698_vm9, %v2094_v63, 1.0 }
 0x118   :  { %v981_v45 = vadd.f32 %v980_v44, %v979_v16  ;;  %v2106_v10 = vpop.xlane.xlu0 %377  ;;  %v866_v36 = vsub.f32 0.0, %v850_v51  ;;  %v2115_v47 = vpop.eup %1166  ;;  %1184 = vrcp.f32 %v409_v37 }
 0x119   :  { %1186 = vlog2.f32 %v619_v0  ;;  %v2127_v16 = vpop.xlane.xlu1 %678  ;;  %vm396_vm11 = vcmp.gt.f32.partialorder %v2106_v10, 0.0 }
 0x11a   :  { %v882_v48 = vadd.f32 %v866_v36, %v802_v54  ;;  %1188 = vrcp.f32 %v601_v32  ;;  %v412_v63 = vsel %vm396_vm11, %v2106_v10, 1.0  ;;  %vm699_vm3 = vcmp.gt.f32.partialorder %v2127_v16, 0.0 }
 0x11b   :  { %1190 = vrcp.f32 %v712_v19 }
 0x11c   :  { %v1169_v55 = vpop.eup %1168  ;;  %v2124_v62 = vpop.xlane.xlu0 %569  ;;  %v962_v21 = vadd.f32 %v946_v30, %v882_v48  ;;  %1192 = vrcp.f32 %v410_v1 }
 0x11d   :  { %v1171_v6 = vpop.eup %1170  ;;  %v761_v58 = vmul.f32 0.6931472, %v1169_v55  ;;  %1194 = vrcp.f32 %v602_v28  ;;  %v2137_v31 = vpop.xlane.xlu1 %380  ;;  %vm588_vm2 = vcmp.gt.f32.partialorder %v2124_v62, 0.0  ;;  %v715_v28 = vsel %vm699_vm3, %v2127_v16, 1.0 }
 0x11e   :  { %v2129_v23 = vpop.eup %1172  ;;  %v905_v39 = vmul.f32 0.6931472, %v1171_v6  ;;  %v982_v12 = vsel %vm974_vm8, %v962_v21, 0.0  ;;  %1196 = vrcp.f32 %v713_v24  ;;  %vm397_vm1 = vcmp.gt.f32.partialorder %v2137_v31, 0.0 }
 0x11f   :  { %v983_v59 = vadd.f32 %v982_v12, %v981_v45  ;;  %v787_v56 = vmax.f32 %v761_v58, -100.0 }
 0x120   :  { %v1175_v11 = vpop.eup %1174  ;;  %v309_v27 = vpop.xlane.xlu0 %308  ;;  %v931_v17 = vmax.f32 %v905_v39, -100.0 }
 0x121   :  { %v2134_v9 = vpop.eup %1176  ;;  %v825_v25 = vmul.f32 0.6931472, %v1175_v11  ;;  %v429_v22 = vmul.f32 %v2059_v13, %v309_v27  ;;  %v733_v18 = vmul.f32 %v1161_v53, %v309_v27  ;;  %v803_v33 = vsub.f32 0.0, %v787_v56  ;;  %v2146_v49 = vpop.xlane.xlu1 %572 }
 0x122   :  { %v2139_v57 = vpop.eup %1178  ;;  %v947_v20 = vsub.f32 0.0, %v931_v17  ;;  %vm589_vm4 = vcmp.gt.f32.partialorder %v2146_v49, 0.0 }
 0x123   :  { %v851_v29 = vmax.f32 %v825_v25, -100.0  ;;  %1198 = vlog2.f32 %v429_v22  ;;  %v1181_v35 = vpop.eup %1180  ;;  %v413_v22 = vsel %vm397_vm1, %v2137_v31, 1.0 }
 0x124   :  { %1200 = vlog2.f32 %v733_v18  ;;  %v501_v42 = vpop.xlane.xlu0 %500  ;;  %v1183_v52 = vpop.eup %1182  ;;  %v763_v37 = vmul.f32 0.6931472, %v1181_v35 }
 0x125   :  { %v867_v13 = vsub.f32 0.0, %v851_v29  ;;  %v621_v34 = vmul.f32 %v2078_v61, %v501_v42  ;;  %1202 = vrcp.f32 %v411_v40  ;;  %v2150_v38 = vpop.eup %1184  ;;  %v907_v26 = vmul.f32 0.6931472, %v1183_v52  ;;  %v312_v61 = vpop.xlane.xlu1 %311 }
 0x126   :  { %v1187_v3 = vpop.eup %1186  ;;  %v788_v46 = vmax.f32 %v763_v37, -100.0  ;;  %v431_v8 = vmul.f32 %v2092_v15, %v312_v61  ;;  %v735_v14 = vmul.f32 %v2115_v47, %v312_v61  ;;  %v604_v47 = vsel %vm588_vm2, %v2124_v62, 1.0 }
 0x127   :  { %v883_v43 = vadd.f32 %v867_v13, %v803_v33  ;;  %1204 = vlog2.f32 %v621_v34  ;;  %v2152_v44 = vpop.eup %1188  ;;  %v827_v45 = vmul.f32 0.6931472, %v1187_v3  ;;  %v932_v0 = vmax.f32 %v907_v26, -100.0 }
 0x128   :  { %1206 = vrcp.f32 %v603_v5  ;;  %v682_v7 = vpop.xlane.xlu0 %681  ;;  %v2156_v51 = vpop.eup %1190  ;;  %v804_v30 = vsub.f32 0.0, %v788_v46  ;;  %v605_v40 = vsel %vm589_vm4, %v2146_v49, 1.0 }
 0x129   :  { %v963_v53 = vadd.f32 %v947_v20, %v883_v43  ;;  %1208 = vrcp.f32 %v714_v60  ;;  %v2162_v54 = vpop.eup %1192  ;;  %v852_v19 = vmax.f32 %v827_v45, -100.0  ;;  %v685_v55 = vpop.xlane.xlu1 %684  ;;  %v948_v21 = vsub.f32 0.0, %v932_v0 }
 0x12a   :  { %1210 = vlog2.f32 %v431_v8  ;;  %v2164_v1 = vpop.eup %1194  ;;  %vm700_vm7 = vcmp.gt.f32.partialorder %v682_v7, 0.0  ;;  %vm701_vm10 = vcmp.gt.f32.partialorder %v685_v55, 0.0 }
 0x12b   :  { %v984_v32 = vsel %vm974_vm8, %v963_v53, 0.0  ;;  %1212 = vlog2.f32 %v735_v14  ;;  %v868_v48 = vsub.f32 0.0, %v852_v19  ;;  %v1197_v6 = vpop.eup %1196  ;;  %v716_v18 = vsel %vm700_vm7, %v682_v7, 1.0 }
 0x12c   :  { %v985_v36 = vadd.f32 %v984_v32, %v983_v59  ;;  %v504_v10 = vpop.xlane.xlu0 %503  ;;  %1214 = vrcp.f32 %v412_v63  ;;  %v717_v60 = vsel %vm701_vm10, %v685_v55, 1.0 }
 0x12d   :  { %v623_v15 = vmul.f32 %v2097_v50, %v504_v10  ;;  %v884_v24 = vadd.f32 %v868_v48, %v804_v30  ;;  %v507_v27 = vpop.xlane.xlu1 %506 }
 0x12e   :  { %v625_v56 = vmul.f32 %v2108_v4, %v507_v27 }
 0x12f   :  { %1216 = vlog2.f32 %v623_v15  ;;  %v964_v59 = vadd.f32 %v948_v21, %v884_v24 }
 0x130   :  { %v1199_v58 = vpop.eup %1198  ;;  %v315_v50 = vpop.xlane.xlu0 %314  ;;  %1218 = vrcp.f32 %v604_v47 }
 0x131   :  { %v1201_v39 = vpop.eup %1200  ;;  %v765_v11 = vmul.f32 0.6931472, %v1199_v58  ;;  %v433_v62 = vmul.f32 %v2104_v41, %v315_v50  ;;  %v737_v12 = vmul.f32 %v2139_v57, %v315_v50  ;;  %1220 = vrcp.f32 %v715_v28  ;;  %v510_v13 = vpop.xlane.xlu1 %509 }
 0x132   :  { %v909_v16 = vmul.f32 0.6931472, %v1201_v39  ;;  %v2178_v25 = vpop.eup %1202  ;;  %v986_v41 = vsel %vm974_vm8, %v964_v59, 0.0  ;;  %v627_v34 = vmul.f32 %v2134_v9, %v510_v13 }
 0x133   :  { %1222 = vlog2.f32 %v433_v62  ;;  %v789_v57 = vmax.f32 %v765_v11, -100.0  ;;  %v987_v4 = vadd.f32 %v986_v41, %v985_v36 }
 0x134   :  { %v1205_v17 = vpop.eup %1204  ;;  %1224 = vlog2.f32 %v737_v12  ;;  %v318_v29 = vpop.xlane.xlu0 %317  ;;  %v933_v35 = vmax.f32 %v909_v16, -100.0 }
 0x135   :  { %v2185_v42 = vpop.eup %1206  ;;  %v829_v33 = vmul.f32 0.6931472, %v1205_v17  ;;  %1226 = vlog2.f32 %v625_v56  ;;  %v435_v31 = vmul.f32 %v2129_v23, %v318_v29  ;;  %v805_v52 = vsub.f32 0.0, %v789_v57  ;;  %v513_v3 = vpop.xlane.xlu1 %512 }
 0x136   :  { %v1209_v5 = vpop.eup %1208  ;;  %1228 = vrcp.f32 %v413_v22  ;;  %v949_v43 = vsub.f32 0.0, %v933_v35  ;;  %v739_v23 = vmul.f32 %v2156_v51, %v318_v29  ;;  %v629_v9 = vmul.f32 %v2152_v44, %v513_v3 }
 0x137   :  { %v853_v49 = vmax.f32 %v829_v33, -100.0  ;;  %1230 = vrcp.f32 %v605_v40  ;;  %v1211_v20 = vpop.eup %1210 }
 0x138   :  { %1232 = vrcp.f32 %v716_v18  ;;  %v321_v37 = vpop.xlane.xlu0 %320  ;;  %v1213_v53 = vpop.eup %1212  ;;  %v767_v61 = vmul.f32 0.6931472, %v1211_v20 }
 0x139   :  { %v869_v26 = vsub.f32 0.0, %v853_v49  ;;  %1234 = vlog2.f32 %v435_v31  ;;  %v437_v7 = vmul.f32 %v2150_v38, %v321_v37  ;;  %v1215_v46 = vpop.eup %1214  ;;  %v911_v45 = vmul.f32 0.6931472, %v1213_v53  ;;  %v516_v10 = vpop.xlane.xlu1 %515 }
 0x13a   :  { %1236 = vlog2.f32 %v627_v34  ;;  %v741_v8 = vmul.f32 %v1197_v6, %v321_v37  ;;  %v790_v14 = vmax.f32 %v767_v61, -100.0  ;;  %v631_v44 = vmul.f32 %v2164_v1, %v516_v10 }
 0x13b   :  { %v885_v63 = vadd.f32 %v869_v26, %v805_v52  ;;  %1238 = vlog2.f32 %v437_v7  ;;  %v934_v19 = vmax.f32 %v911_v45, -100.0 }
 0x13c   :  { %v1217_v32 = vpop.eup %1216  ;;  %1240 = vrcp.f32 %v717_v60  ;;  %v324_v36 = vpop.xlane.xlu0 %323  ;;  %v806_v58 = vsub.f32 0.0, %v790_v14 }
 0x13d   :  { %v965_v0 = vadd.f32 %v949_v43, %v885_v63  ;;  %v831_v38 = vmul.f32 0.6931472, %v1217_v32  ;;  %1242 = vlog2.f32 %v629_v9  ;;  %v1219_v15 = vpop.eup %1218  ;;  %v439_v51 = vmul.f32 %v2162_v54, %v324_v36  ;;  %v519_v62 = vpop.xlane.xlu1 %518 }
 0x13e   :  { %1244 = vlog2.f32 %v739_v23  ;;  %v743_v55 = vmul.f32 %v1209_v5, %v324_v36  ;;  %v1221_v30 = vpop.eup %1220  ;;  %v950_v21 = vsub.f32 0.0, %v934_v19  ;;  %v633_v59 = vmul.f32 %v2185_v42, %v519_v62 }
 0x13f   :  { %v988_v48 = vsel %vm974_vm8, %v965_v0, 0.0  ;;  %v854_v47 = vmax.f32 %v831_v38, -100.0  ;;  %1246 = vlog2.f32 %v741_v8 }
 0x140   :  { %v1223_v6 = vpop.eup %1222  ;;  %v989_v28 = vadd.f32 %v988_v48, %v987_v4  ;;  %1248 = vlog2.f32 %v439_v51  ;;  %v327_v24 = vpop.xlane.xlu0 %326 }
 0x141   :  { %v1225_v50 = vpop.eup %1224  ;;  %v870_v39 = vsub.f32 0.0, %v854_v47  ;;  %v769_v11 = vmul.f32 0.6931472, %v1223_v6  ;;  %1250 = vlog2.f32 %v743_v55  ;;  %v441_v54 = vmul.f32 %v2178_v25, %v327_v24  ;;  %v522_v35 = vpop.xlane.xlu1 %521 }
 0x142   :  { %v1227_v12 = vpop.eup %1226  ;;  %v913_v1 = vmul.f32 0.6931472, %v1225_v50  ;;  %1252 = vlog2.f32 %v631_v44  ;;  %v745_v27 = vmul.f32 %v1221_v30, %v327_v24  ;;  %v635_v49 = vmul.f32 %v1219_v15, %v522_v35 }
 0x143   :  { %v1229_v16 = vpop.eup %1228  ;;  %v886_v56 = vadd.f32 %v870_v39, %v806_v58  ;;  %v791_v22 = vmax.f32 %v769_v11, -100.0  ;;  %v833_v40 = vmul.f32 0.6931472, %v1227_v12  ;;  %1254 = vlog2.f32 %v441_v54 }
 0x144   :  { %v1231_v18 = vpop.eup %1230  ;;  %v935_v17 = vmax.f32 %v913_v1, -100.0  ;;  %1256 = vlog2.f32 %v745_v27  ;;  %v330_v41 = vpop.xlane.xlu0 %329 }
 0x145   :  { %v1233_v57 = vpop.eup %1232  ;;  %v966_v29 = vadd.f32 %v950_v21, %v886_v56  ;;  %v807_v4 = vsub.f32 0.0, %v791_v22  ;;  %v855_v25 = vmax.f32 %v833_v40, -100.0  ;;  %1258 = vlog2.f32 %v633_v59  ;;  %v525_v23 = vpop.xlane.xlu1 %524 }
 0x146   :  { %v1235_v33 = vpop.eup %1234  ;;  %v443_v13 = vmul.f32 %v1215_v46, %v330_v41  ;;  %v747_v5 = vmul.f32 %v1233_v57, %v330_v41  ;;  %v951_v37 = vsub.f32 0.0, %v935_v17  ;;  %v637_v38 = vmul.f32 %v1231_v18, %v525_v23 }
 0x147   :  { %v1237_v31 = vpop.eup %1236  ;;  %v990_v42 = vsel %vm974_vm8, %v966_v29, 0.0  ;;  %v871_v34 = vsub.f32 0.0, %v855_v25  ;;  %v771_v26 = vmul.f32 0.6931472, %v1235_v33 }
 0x148   :  { %v1239_v52 = vpop.eup %1238  ;;  %v991_v60 = vadd.f32 %v990_v42, %v989_v28  ;;  %1260 = vlog2.f32 %v443_v13  ;;  %v835_v7 = vmul.f32 0.6931472, %v1237_v31  ;;  %v333_v3 = vpop.xlane.xlu0 %332 }
 0x149   :  { %v1241_v20 = vpop.eup %1240  ;;  %v887_v43 = vadd.f32 %v871_v34, %v807_v4  ;;  %1262 = vlog2.f32 %v747_v5  ;;  %v773_v61 = vmul.f32 0.6931472, %v1239_v52  ;;  %v445_v8 = vmul.f32 %v1229_v16, %v333_v3 }
 0x14a   :  { %v1243_v53 = vpop.eup %1242  ;;  %1264 = vlog2.f32 %v635_v49  ;;  %v749_v32 = vmul.f32 %v1241_v20, %v333_v3  ;;  %v792_v0 = vmax.f32 %v771_v26, -100.0  ;;  %v856_v19 = vmax.f32 %v835_v7, -100.0 }
 0x14b   :  { %v1245_v9 = vpop.eup %1244  ;;  %v967_v46 = vadd.f32 %v951_v37, %v887_v43  ;;  %v837_v63 = vmul.f32 0.6931472, %v1243_v53  ;;  %v793_v51 = vmax.f32 %v773_v61, -100.0  ;;  %1266 = vlog2.f32 %v445_v8 }
 0x14c   :  { %v1247_v45 = vpop.eup %1246  ;;  %v915_v48 = vmul.f32 0.6931472, %v1245_v9  ;;  %1268 = vlog2.f32 %v749_v32  ;;  %v808_v24 = vsub.f32 0.0, %v792_v0  ;;  %v872_v50 = vsub.f32 0.0, %v856_v19 }
 0x14d   :  { %v1249_v14 = vpop.eup %1248  ;;  %v992_v36 = vsel %vm974_vm8, %v967_v46, 0.0  ;;  %v857_v55 = vmax.f32 %v837_v63, -100.0  ;;  %v917_v6 = vmul.f32 0.6931472, %v1247_v45  ;;  %1270 = vlog2.f32 %v637_v38 }
 0x14e   :  { %v1251_v10 = vpop.eup %1250  ;;  %v2200_v15 = vadd.f32 %v992_v36, %v991_v60  ;;  %v775_v44 = vmul.f32 0.6931472, %v1249_v14  ;;  %v809_v54 = vsub.f32 0.0, %v793_v51  ;;  %v936_v27 = vmax.f32 %v915_v48, -100.0 }
 0x14f   :  { %v1253_v30 = vpop.eup %1252  ;;  %v873_v62 = vsub.f32 0.0, %v857_v55  ;;  %v919_v12 = vmul.f32 0.6931472, %v1251_v10  ;;  %v937_v56 = vmax.f32 %v917_v6, -100.0  ;;  %v888_v17 = vadd.f32 %v872_v50, %v808_v24 }
 0x150   :  { %v1255_v47 = vpop.eup %1254  ;;  %v794_v28 = vmax.f32 %v775_v44, -100.0  ;;  %v839_v58 = vmul.f32 0.6931472, %v1253_v30  ;;  %v952_v13 = vsub.f32 0.0, %v936_v27 }
 0x151   :  { %v1257_v21 = vpop.eup %1256  ;;  %v777_v39 = vmul.f32 0.6931472, %v1255_v47  ;;  %v889_v4 = vadd.f32 %v873_v62, %v809_v54  ;;  %v938_v25 = vmax.f32 %v919_v12, -100.0  ;;  %v953_v34 = vsub.f32 0.0, %v937_v56 }
 0x152   :  { %v1259_v11 = vpop.eup %1258  ;;  %v858_v1 = vmax.f32 %v839_v58, -100.0  ;;  %v810_v22 = vsub.f32 0.0, %v794_v28  ;;  %v921_v41 = vmul.f32 0.6931472, %v1257_v21  ;;  %v968_v37 = vadd.f32 %v952_v13, %v888_v17 }
 0x153   :  { %v795_v59 = vmax.f32 %v777_v39, -100.0  ;;  %v841_v16 = vmul.f32 0.6931472, %v1259_v11  ;;  %v969_v43 = vadd.f32 %v953_v34, %v889_v4  ;;  %v954_v26 = vsub.f32 0.0, %v938_v25 }
 0x154   :  { %v874_v40 = vsub.f32 0.0, %v858_v1  ;;  %v939_v20 = vmax.f32 %v921_v41, -100.0  ;;  %v994_v45 = vsel %vm974_vm8, %v968_v37, 0.0 }
 0x155   :  { %v1261_v18 = vpop.eup %1260  ;;  %v859_v57 = vmax.f32 %v841_v16, -100.0  ;;  %v811_v5 = vsub.f32 0.0, %v795_v59  ;;  %v996_v19 = vsel %vm974_vm8, %v969_v43, 0.0  ;;  %v995_v44 = vadd.f32 %v994_v45, %v2200_v15  ;;  %v217_v59 = vpop.xlane.xlu0 %216 }
 0x156   :  { %v1263_v29 = vpop.eup %1262  ;;  %v779_v35 = vmul.f32 0.6931472, %v1261_v18  ;;  %v890_v49 = vadd.f32 %v874_v40, %v810_v22  ;;  %v955_v8 = vsub.f32 0.0, %v939_v20  ;;  %v218_v16 = vrot.slane %v217_v59, 4 }
 0x157   :  { %v1265_v33 = vpop.eup %1264  ;;  %v875_v31 = vsub.f32 0.0, %v859_v57  ;;  %v923_v42 = vmul.f32 0.6931472, %v1263_v29  ;;  %v997_v58 = vadd.f32 %v996_v19, %v995_v44 }
 0x158   :  { %v796_v52 = vmax.f32 %v779_v35, -100.0  ;;  %v843_v60 = vmul.f32 0.6931472, %v1265_v33  ;;  %v1267_v23 = vpop.eup %1266  ;;  %v970_v9 = vadd.f32 %v954_v26, %v890_v49  ;;  %v219_v56 = vadd.f32 %v218_v16, %v217_v59 }
 0x159   :  { %v891_v53 = vadd.f32 %v875_v31, %v811_v5  ;;  %v940_v61 = vmax.f32 %v923_v42, -100.0  ;;  %v1269_v63 = vpop.eup %1268  ;;  %v781_v32 = vmul.f32 0.6931472, %v1267_v23 }
 0x15a   :  { %v812_v7 = vsub.f32 0.0, %v796_v52  ;;  %v860_v3 = vmax.f32 %v843_v60, -100.0  ;;  %v1271_v14 = vpop.eup %1270  ;;  %v925_v0 = vmul.f32 0.6931472, %v1269_v63  ;;  %v998_v30 = vsel %vm974_vm8, %v970_v9, 0.0 }
 0x15b   :  { %v956_v38 = vsub.f32 0.0, %v940_v61  ;;  %v797_v10 = vmax.f32 %v781_v32, -100.0  ;;  %v845_v51 = vmul.f32 0.6931472, %v1271_v14  ;;  %v971_v55 = vadd.f32 %v955_v8, %v891_v53 }
 0x15c   :  { %v876_v46 = vsub.f32 0.0, %v860_v3  ;;  %v941_v47 = vmax.f32 %v925_v0, -100.0  ;;  %v999_v50 = vadd.f32 %v998_v30, %v997_v58  ;;  %v220_v22 = vrot.slane %v219_v56, 2 }
 0x15d   :  { %v813_v48 = vsub.f32 0.0, %v797_v10  ;;  %v861_v6 = vmax.f32 %v845_v51, -100.0  ;;  %v1000_v24 = vsel %vm974_vm8, %v971_v55, 0.0 }
 0x15e   :  { %v892_v36 = vadd.f32 %v876_v46, %v812_v7  ;;  %v957_v11 = vsub.f32 0.0, %v941_v47  ;;  %v1001_v62 = vadd.f32 %v1000_v24, %v999_v50  ;;  %v221_v40 = vadd.f32 %v220_v22, %v219_v56 }
 0x15f   :  { %v877_v21 = vsub.f32 0.0, %v861_v6 }
 0x160   :  { %v972_v28 = vadd.f32 %v956_v38, %v892_v36  ;;  %v222_v18 = vrot.slane %v221_v40, 1 }
 0x161   :  { %v893_v39 = vadd.f32 %v877_v21, %v813_v48 }
 0x162   :  { %v1002_v54 = vsel %vm974_vm8, %v972_v28, 0.0  ;;  %v223_v17 = vadd.f32 %v222_v18, %v221_v40 }
 0x163   :  { %v973_v12 = vadd.f32 %v957_v11, %v893_v39  ;;  %v1003_v1 = vadd.f32 %v1002_v54, %v1001_v62 }
 0x164   :  { %1039 = vpush %v223_v17 }
 0x165   :  { %v1004_v15 = vsel %vm974_vm8, %v973_v12, 0.0  ;;  %vm1015_vm8 = vcmp.eq.s32.totalorder %v1366_v2, 0 }
 0x166   :  { %v1005_v27 = vadd.f32 %v1004_v15, %v1003_v1 }
 0x168   :  { %1006 = vadd.xlane.f32.xlu1 %v1005_v27 }
 0x195   :  { %s1040_s0 = spop %1039 }
 0x196   :  { %v1016_v13 = vstv %s1040_s0 }
 0x197   :  { %v1017_v31 = vsel %vm1015_vm8, %v1016_v13, 0.0 }
 0x1f1   :  { %v1007_v41 = vpop.xlane.xlu1 %1006 }
 0x1f2   :  { %v1008_v57 = vrot.slane %v1007_v41, 4 }
 0x1f4   :  { %v1009_v29 = vadd.f32 %v1008_v57, %v1007_v41 }
 0x1f6   :  { %v1010_v4 = vrot.slane %v1009_v29, 2 }
 0x1f8   :  { %v1011_v25 = vadd.f32 %v1010_v4, %v1009_v29 }
 0x1fa   :  { %v1012_v35 = vrot.slane %v1011_v25, 1 }
 0x1fc   :  { %v1013_v33 = vadd.f32 %v1012_v35, %v1011_v25 }
 0x1fe   :  { %1041 = vpush %v1013_v33 }
 0x22f   :  { %s1042_s1 = spop %1041 }
 0x230   :  { %v1019_v5 = vstv %s1042_s1 }
 0x231   :  { %v1020_v42 = vsel %vm1018_vm12, %v1019_v5, 0.0 }
 0x232   :  { %v1021_v34 = vadd.f32 %v1020_v42, %v1017_v31 }
 0x234   :  { %1022 = vst [vmem:[#allocation7] sm:$0x1] %v1021_v34 }
 0x235   :  { %1323 = shalt.err (!%p1320_p0)
}
 0x236   :  { %1032 = dma.vmem_to_hbm [thread:$0]  %s1030_s22, 16, %s2216_s2, [#allocation4]  }
 0x237   :  { %1336 = dma.done.wait [#allocation4], 16  }
 0x238   :  { %1337 = vsyncadd [#allocation4], 4294967280 }
 0x239   :  { %1036 = vsyncpa [#allocation3], 1 }
 0x23a   :  { %1037 = vsyncpa [#allocation6], 1 }
 0x23b   :  { %1038 = vsyncpa [#allocation4], 1 }

</bundles_post_ra>
